<compile_context>
chip_gen: v5e
topology: v5e:2x2
jax: 0.10.0
libtpu: 0.0.40
codegen_flags: <defaults>
</compile_context>

<pallas_src>
import jax
import jax.numpy as jnp
from jax.experimental import pallas as pl
from jax.experimental.pallas import tpu as pltpu
from typing import NamedTuple

# ----------------------------- hyper-params ---------------------------------
Z_SIZE = 8
ENC_H = 16
DEC_H = 16
SOC_FEAT = 0          # social_feat_size = 0 -> social branch is skipped
EMB_DIM = 16
LT_DIM = 16           # long_term_emb_dim
PRED_LEN = 1
MAX_INP_LEN = 8       # max_inp_len (scaled down from 30 for the example)
INP_FORMAT = "rel"    # encoder input = in_dxdy
EPS = 1e-6


class GeneratorOutput(NamedTuple):
    pred_dxdy: jnp.ndarray
    pred_xy: jnp.ndarray


_WEIGHT_ORDER = (
    "enc_emb_w", "enc_emb_b", "enc_wih", "enc_whh", "enc_b",
    "lte_rel_w", "lte_rel_b", "lte_vel_w", "lte_vel_b",
    "lte_mlp_wv", "lte_mlp_wr", "lte_mlp_b",
    "e2d_w_enc", "e2d_w_lt", "e2d_w_z", "e2d_b",
    "dec_emb_w", "dec_emb_b", "dec_wih", "dec_whh", "dec_b",
    "dec_out_w", "dec_out_b",
)


# ------------------------------ fused kernel ---------------------------------
def _ltm_kernel(
        xy_ref, dxdy_ref, noise_ref,
        enc_emb_w, enc_emb_b, enc_wih, enc_whh, enc_b,
        lte_rel_w, lte_rel_b, lte_vel_w, lte_vel_b,
        lte_mlp_wv, lte_mlp_wr, lte_mlp_b,
        e2d_w_enc, e2d_w_lt, e2d_w_z, e2d_b,
        dec_emb_w, dec_emb_b, dec_wih, dec_whh, dec_b, dec_out_w, dec_out_b,
        abs_ref, rel_ref):
    f32 = jnp.float32
    T, B, _ = xy_ref.shape          # T = history length, B = batch block

    # -------- xywh_to_cxcy (entirely on register values, no partial stores) --
    xy = xy_ref[...]                                       # (T, B, 4)
    dxdy = dxdy_ref[...]
    cxcy = xy[:, :, 0:2] + 0.5 * xy[:, :, 2:4]             # (T, B, 2)
    wh = xy[:, :, 2:4]                                     # (T, B, 2)
    # row 0: xy-part kept from original in_dxdy, wh-part zeroed; rows 1..T-1:
    # center diffs and log size ratios (matches in-place PyTorch semantics).
    d_xy = jnp.concatenate([dxdy[0:1, :, 0:2], cxcy[1:] - cxcy[:-1]], axis=0)
    d_wh = jnp.concatenate(
        [jnp.zeros((1, B, 2), f32),
         jnp.log((wh[1:] + EPS) / (wh[:-1] + EPS))], axis=0)

    # -------- TrajectoryEncoder ('rel' input), non-recurrent matmuls hoisted --
    # TODO(synk): TrajectoryEncoder source not provided; Linear embedding (no
    # activation) + PyTorch-gate-order (i,f,g,o) LSTM, single bias.
    t0 = max(T - MAX_INP_LEN, 0)            # trim to the last max_inp_len steps
    Ts = T - t0
    x2d = jnp.concatenate(                                  # (Ts*B, 4) time-major
        [jnp.concatenate([d_xy[t], d_wh[t]], axis=-1) for t in range(t0, T)],
        axis=0)
    emb = jnp.dot(x2d, enc_emb_w[...], preferred_element_type=f32) + enc_emb_b[...]
    g_in = jnp.dot(emb, enc_wih[...], preferred_element_type=f32) + enc_b[...]  # (Ts*B, 4H)

    whh = enc_whh[...]
    h = jnp.zeros((B, ENC_H), f32)
    c = jnp.zeros((B, ENC_H), f32)
    for t in range(Ts):                      # unrolled: Ts <= MAX_INP_LEN (static)
        gates = g_in[t * B:(t + 1) * B, :] + jnp.dot(h, whh, preferred_element_type=f32)
        i_g = jax.nn.sigmoid(gates[:, 0:ENC_H])
        f_g = jax.nn.sigmoid(gates[:, ENC_H:2 * ENC_H])
        g_g = jnp.tanh(gates[:, 2 * ENC_H:3 * ENC_H])
        o_g = jax.nn.sigmoid(gates[:, 3 * ENC_H:4 * ENC_H])
        c = f_g * c + i_g * g_g
        h = o_g * jnp.tanh(c)
    enc_h = h                                               # (B, ENC_H)

    # -------- LongTermEncoder: history = converted xy minus last frame --------
    # TODO(synk): get_module_LTE source not provided; the full-time-width convs
    # are expressed as (B, C*L) @ (C*L, F) matmuls on flattened windows.
    lt_hi = T - 1
    lt_lo = max(lt_hi - MAX_INP_LEN, 0)
    n_hist = lt_hi - lt_lo
    n_pad = MAX_INP_LEN - n_hist
    if n_hist == 0:
        lte_cxcy = jnp.zeros((MAX_INP_LEN, B, 2), f32)
        lte_wh = jnp.zeros((MAX_INP_LEN, B, 2), f32)
    else:
        lte_cxcy = cxcy[lt_lo:lt_hi]
        lte_wh = wh[lt_lo:lt_hi]
        if n_pad > 0:                        # zero-pad at the front (F.pad semantics)
            zpad = jnp.zeros((n_pad, B, 2), f32)
            lte_cxcy = jnp.concatenate([zpad, lte_cxcy], axis=0)
            lte_wh = jnp.concatenate([zpad, lte_wh], axis=0)
    L = MAX_INP_LEN

    relq = lte_wh / (lte_cxcy + EPS)                        # (L, B, 2)
    xyxy_lo = lte_cxcy
    xyxy_hi = lte_cxcy + lte_wh
    vel_lo = xyxy_lo[1:] - xyxy_lo[:-1]                     # (L-1, B, 2)
    vel_hi = xyxy_hi[1:] - xyxy_hi[:-1]

    rel_flat = jnp.concatenate([relq[l] for l in range(L)], axis=-1)       # (B, 2L)
    vel_flat = jnp.concatenate(
        [jnp.concatenate([vel_lo[l], vel_hi[l]], axis=-1) for l in range(L - 1)],
        axis=-1)                                                            # (B, 4(L-1))

    rel_emb = jnp.maximum(
        jnp.dot(rel_flat, lte_rel_w[...], preferred_element_type=f32)
        + lte_rel_b[...], 0.0)                                              # (B, 4)
    vel_emb = jnp.maximum(
        jnp.dot(vel_flat, lte_vel_w[...], preferred_element_type=f32)
        + lte_vel_b[...], 0.0)                                              # (B, 16)
    # encoder_mlp on concat((vel_emb, rel_emb)) expressed as split-weight dots
    lt_feats = jnp.maximum(
        jnp.dot(vel_emb, lte_mlp_wv[...], preferred_element_type=f32)
        + jnp.dot(rel_emb, lte_mlp_wr[...], preferred_element_type=f32)
        + lte_mlp_b[...], 0.0)                                              # (B, LT_DIM)

    # -------- enc_h_to_dec_h on [enc_h | lt_feats | noise] as split dots ------
    noise = noise_ref[...]                                  # (1, Z), shared sub-batch
    dec_h = jnp.maximum(
        jnp.dot(enc_h, e2d_w_enc[...], preferred_element_type=f32)
        + jnp.dot(lt_feats, e2d_w_lt[...], preferred_element_type=f32)
        + jnp.dot(noise, e2d_w_z[...], preferred_element_type=f32)   # (1,H) broadcast
        + e2d_b[...], 0.0)                                              # (B, DEC_H)

    # -------- RelativeDecoder: one LSTM-cell step (pred_len = 1) --------------
    # TODO(synk): RelativeDecoder source not provided; Linear+ReLU spatial
    # embedding of the last offset, LSTM cell, Linear output head.
    last_xy = jnp.concatenate([cxcy[-1], wh[-1]], axis=-1)   # (B, 4)
    last_d = jnp.concatenate([d_xy[-1], d_wh[-1]], axis=-1)  # (B, 4)

    demb = jnp.maximum(
        jnp.dot(last_d, dec_emb_w[...], preferred_element_type=f32)
        + dec_emb_b[...], 0.0)
    gates = (jnp.dot(demb, dec_wih[...], preferred_element_type=f32)
             + jnp.dot(dec_h, dec_whh[...], preferred_element_type=f32)
             + dec_b[...])
    i_g = jax.nn.sigmoid(gates[:, 0:DEC_H])
    g_g = jnp.tanh(gates[:, 2 * DEC_H:3 * DEC_H])
    o_g = jax.nn.sigmoid(gates[:, 3 * DEC_H:4 * DEC_H])
    c_new = i_g * g_g                    # initial cell state is zero -> f*c0 == 0
    h_new = o_g * jnp.tanh(c_new)

    rel_out = jnp.dot(h_new, dec_out_w[...], preferred_element_type=f32) + dec_out_b[...]
    abs_out = jnp.concatenate(
        [last_xy[:, 0:2] + rel_out[:, 0:2],
         last_xy[:, 2:4] * jnp.exp(rel_out[:, 2:4])], axis=-1)

    # single full-ref stores (no masked partial-lane writes)
    rel_ref[...] = rel_out
    abs_ref[...] = abs_out


# ------------------------------ parameters -----------------------------------
def init_params(key):
    keys = iter(jax.random.split(key, 40))

    def lin(fi, fo):
        s = 1.0 / (fi ** 0.5)
        w = jax.random.uniform(next(keys), (fi, fo), jnp.float32, -s, s)
        b = jax.random.uniform(next(keys), (1, fo), jnp.float32, -s, s)
        return w, b

    p = {}
    # TrajectoryEncoder
    p["enc_emb_w"], p["enc_emb_b"] = lin(4, EMB_DIM)
    p["enc_wih"], p["enc_b"] = lin(EMB_DIM, 4 * ENC_H)
    p["enc_whh"], _ = lin(ENC_H, 4 * ENC_H)
    # LongTermEncoder (conv weights already flattened to matmul form)
    p["lte_rel_w"], p["lte_rel_b"] = lin(2 * MAX_INP_LEN, 4)
    p["lte_vel_w"], p["lte_vel_b"] = lin(4 * (MAX_INP_LEN - 1), 16)
    lte_mlp_w, p["lte_mlp_b"] = lin(4 + 16, LT_DIM)
    p["lte_mlp_wv"], p["lte_mlp_wr"] = lte_mlp_w[:16], lte_mlp_w[16:]
    # enc_h_to_dec_h, pre-split into [enc_h | lt_feats | noise] row blocks
    e2d_w, p["e2d_b"] = lin(ENC_H + LT_DIM + Z_SIZE + SOC_FEAT, DEC_H)
    p["e2d_w_enc"] = e2d_w[0:ENC_H]
    p["e2d_w_lt"] = e2d_w[ENC_H:ENC_H + LT_DIM]
    p["e2d_w_z"] = e2d_w[ENC_H + LT_DIM:ENC_H + LT_DIM + Z_SIZE]
    # RelativeDecoder
    p["dec_emb_w"], p["dec_emb_b"] = lin(4, EMB_DIM)
    p["dec_wih"], p["dec_b"] = lin(EMB_DIM, 4 * DEC_H)
    p["dec_whh"], _ = lin(DEC_H, 4 * DEC_H)
    p["dec_out_w"], p["dec_out_b"] = lin(DEC_H, 4)
    return p


# ------------------------------ full forward ---------------------------------
def long_term_motion_forward(params, in_xy, in_dxdy, noise_key):
    T, B, _ = in_xy.shape

    # get_global_noise: one gaussian vector shared across the (single) sub-batch
    n_samples = 1
    noise = jax.random.normal(noise_key, (1, Z_SIZE), jnp.float32)

    weights = [params[k] for k in _WEIGHT_ORDER]

    # Batch-block grid: whole batch in one block for small B; 128-row blocks
    # (sublane aligned) for large B so the parallel grid axis can be sharded
    # across the two TensorCores of a v7x chip.
    if B >= 256 and B % 128 == 0:
        bb = 128
    else:
        bb = B
    grid = (B // bb,)

    seq_spec = pl.BlockSpec((T, bb, 4), lambda i: (0, i, 0))
    noise_spec = pl.BlockSpec((1, Z_SIZE), lambda i: (0, 0))

    def w_spec(w):
        return pl.BlockSpec(w.shape, lambda i: (0, 0))     # weights broadcast

    in_specs = [seq_spec, seq_spec, noise_spec] + [w_spec(w) for w in weights]
    out_specs = (pl.BlockSpec((bb, 4), lambda i: (i, 0)),
                 pl.BlockSpec((bb, 4), lambda i: (i, 0)))

    pred_abs, pred_rel = pl.pallas_call(
        _ltm_kernel,
        out_shape=(jax.ShapeDtypeStruct((B, 4), jnp.float32),
                   jax.ShapeDtypeStruct((B, 4), jnp.float32)),
        grid=grid,
        in_specs=in_specs,
        out_specs=out_specs,
        compiler_params=pltpu.CompilerParams(dimension_semantics=("parallel",)),
    )(in_xy, in_dxdy, noise, *weights)

    pred_xy = pred_abs.reshape(PRED_LEN, n_samples, B, 4)
    pred_dxdy = pred_rel.reshape(PRED_LEN, n_samples, B, 4)
    return GeneratorOutput(pred_dxdy=pred_dxdy, pred_xy=pred_xy)


# ---------------------------------- main --------------------------------------
if __name__ == "__main__":
    key = jax.random.PRNGKey(0)
    k_xy, k_d, k_p, k_n = jax.random.split(key, 4)

    T = MAX_INP_LEN + 1     # history length (9) -> exercises the trim branch
    B = 8                   # batch size (sublane aligned)
    # positive boxes so that log((w+eps)/(w'+eps)) is well defined
    in_xy = jax.random.uniform(k_xy, (T, B, 4), jnp.float32, 0.5, 2.0)
    in_dxdy = 0.1 * jax.random.normal(k_d, (T, B, 4), jnp.float32)

    params = init_params(k_p)
    out = long_term_motion_forward(params, in_xy, in_dxdy, k_n)
    jax.block_until_ready(out)
    assert out.pred_xy.shape == (PRED_LEN, 1, B, 4)
    assert out.pred_dxdy.shape == (PRED_LEN, 1, B, 4)
    print("KERNEL_OK")
</pallas_src>

<mosaic_0001>
module attributes {stable_mosaic.version = 11 : i64} {
  func.func @_ltm_kernel(%arg0: i32, %arg1: memref<9x8x4xf32, #tpu.memory_space<vmem>>, %arg2: memref<9x8x4xf32, #tpu.memory_space<vmem>>, %arg3: memref<1x8xf32, #tpu.memory_space<vmem>>, %arg4: memref<4x16xf32, #tpu.memory_space<vmem>>, %arg5: memref<1x16xf32, #tpu.memory_space<vmem>>, %arg6: memref<16x64xf32, #tpu.memory_space<vmem>>, %arg7: memref<16x64xf32, #tpu.memory_space<vmem>>, %arg8: memref<1x64xf32, #tpu.memory_space<vmem>>, %arg9: memref<16x4xf32, #tpu.memory_space<vmem>>, %arg10: memref<1x4xf32, #tpu.memory_space<vmem>>, %arg11: memref<28x16xf32, #tpu.memory_space<vmem>>, %arg12: memref<1x16xf32, #tpu.memory_space<vmem>>, %arg13: memref<16x16xf32, #tpu.memory_space<vmem>>, %arg14: memref<4x16xf32, #tpu.memory_space<vmem>>, %arg15: memref<1x16xf32, #tpu.memory_space<vmem>>, %arg16: memref<16x16xf32, #tpu.memory_space<vmem>>, %arg17: memref<16x16xf32, #tpu.memory_space<vmem>>, %arg18: memref<8x16xf32, #tpu.memory_space<vmem>>, %arg19: memref<1x16xf32, #tpu.memory_space<vmem>>, %arg20: memref<4x16xf32, #tpu.memory_space<vmem>>, %arg21: memref<1x16xf32, #tpu.memory_space<vmem>>, %arg22: memref<16x64xf32, #tpu.memory_space<vmem>>, %arg23: memref<16x64xf32, #tpu.memory_space<vmem>>, %arg24: memref<1x64xf32, #tpu.memory_space<vmem>>, %arg25: memref<16x4xf32, #tpu.memory_space<vmem>>, %arg26: memref<1x4xf32, #tpu.memory_space<vmem>>, %arg27: memref<8x4xf32, #tpu.memory_space<vmem>>, %arg28: memref<8x4xf32, #tpu.memory_space<vmem>>) attributes {dimension_semantics = [#tpu.dimension_semantics<parallel>], iteration_bounds = array<i64: 1>, scalar_prefetch = 0 : i64, scratch_operands = 0 : i64, tpu.core_type = #tpu.core_type<tc>, window_params = [{transform_indices = @transform_0, window_bounds = array<i64: 9, 8, 4>}, {transform_indices = @transform_1, window_bounds = array<i64: 9, 8, 4>}, {pipeline_mode = #tpu.pipeline_mode<synchronous>, transform_indices = @transform_2, window_bounds = array<i64: 1, 8>}, {pipeline_mode = #tpu.pipeline_mode<synchronous>, transform_indices = @transform_3, window_bounds = array<i64: 4, 16>}, {pipeline_mode = #tpu.pipeline_mode<synchronous>, transform_indices = @transform_4, window_bounds = array<i64: 1, 16>}, {pipeline_mode = #tpu.pipeline_mode<synchronous>, transform_indices = @transform_5, window_bounds = array<i64: 16, 64>}, {pipeline_mode = #tpu.pipeline_mode<synchronous>, transform_indices = @transform_6, window_bounds = array<i64: 16, 64>}, {pipeline_mode = #tpu.pipeline_mode<synchronous>, transform_indices = @transform_7, window_bounds = array<i64: 1, 64>}, {pipeline_mode = #tpu.pipeline_mode<synchronous>, transform_indices = @transform_8, window_bounds = array<i64: 16, 4>}, {pipeline_mode = #tpu.pipeline_mode<synchronous>, transform_indices = @transform_9, window_bounds = array<i64: 1, 4>}, {pipeline_mode = #tpu.pipeline_mode<synchronous>, transform_indices = @transform_10, window_bounds = array<i64: 28, 16>}, {pipeline_mode = #tpu.pipeline_mode<synchronous>, transform_indices = @transform_11, window_bounds = array<i64: 1, 16>}, {pipeline_mode = #tpu.pipeline_mode<synchronous>, transform_indices = @transform_12, window_bounds = array<i64: 16, 16>}, {pipeline_mode = #tpu.pipeline_mode<synchronous>, transform_indices = @transform_13, window_bounds = array<i64: 4, 16>}, {pipeline_mode = #tpu.pipeline_mode<synchronous>, transform_indices = @transform_14, window_bounds = array<i64: 1, 16>}, {pipeline_mode = #tpu.pipeline_mode<synchronous>, transform_indices = @transform_15, window_bounds = array<i64: 16, 16>}, {pipeline_mode = #tpu.pipeline_mode<synchronous>, transform_indices = @transform_16, window_bounds = array<i64: 16, 16>}, {pipeline_mode = #tpu.pipeline_mode<synchronous>, transform_indices = @transform_17, window_bounds = array<i64: 8, 16>}, {pipeline_mode = #tpu.pipeline_mode<synchronous>, transform_indices = @transform_18, window_bounds = array<i64: 1, 16>}, {pipeline_mode = #tpu.pipeline_mode<synchronous>, transform_indices = @transform_19, window_bounds = array<i64: 4, 16>}, {pipeline_mode = #tpu.pipeline_mode<synchronous>, transform_indices = @transform_20, window_bounds = array<i64: 1, 16>}, {pipeline_mode = #tpu.pipeline_mode<synchronous>, transform_indices = @transform_21, window_bounds = array<i64: 16, 64>}, {pipeline_mode = #tpu.pipeline_mode<synchronous>, transform_indices = @transform_22, window_bounds = array<i64: 16, 64>}, {pipeline_mode = #tpu.pipeline_mode<synchronous>, transform_indices = @transform_23, window_bounds = array<i64: 1, 64>}, {pipeline_mode = #tpu.pipeline_mode<synchronous>, transform_indices = @transform_24, window_bounds = array<i64: 16, 4>}, {pipeline_mode = #tpu.pipeline_mode<synchronous>, transform_indices = @transform_25, window_bounds = array<i64: 1, 4>}, {transform_indices = @transform_26, window_bounds = array<i64: 8, 4>}, {transform_indices = @transform_27, window_bounds = array<i64: 8, 4>}]} {
    %c0 = arith.constant 0 : index
    %c0_0 = arith.constant 0 : index
    %c0_1 = arith.constant 0 : index
    %0 = vector.load %arg1[%c0, %c0_0, %c0_1] : memref<9x8x4xf32, #tpu.memory_space<vmem>>, vector<9x8x4xf32>
    %c0_2 = arith.constant 0 : index
    %c0_3 = arith.constant 0 : index
    %c0_4 = arith.constant 0 : index
    %1 = vector.load %arg2[%c0_2, %c0_3, %c0_4] : memref<9x8x4xf32, #tpu.memory_space<vmem>>, vector<9x8x4xf32>
    %2 = vector.extract_strided_slice %0 {offsets = [0, 0, 0], sizes = [9, 8, 2], strides = [1, 1, 1]} : vector<9x8x4xf32> to vector<9x8x2xf32>
    %3 = vector.extract_strided_slice %0 {offsets = [0, 0, 2], sizes = [9, 8, 2], strides = [1, 1, 1]} : vector<9x8x4xf32> to vector<9x8x2xf32>
    %cst = arith.constant 5.000000e-01 : f32
    %4 = vector.broadcast %cst : f32 to vector<9x8x2xf32>
    %5 = arith.mulf %4, %3 : vector<9x8x2xf32>
    %6 = arith.addf %2, %5 : vector<9x8x2xf32>
    %7 = vector.extract_strided_slice %0 {offsets = [0, 0, 2], sizes = [9, 8, 2], strides = [1, 1, 1]} : vector<9x8x4xf32> to vector<9x8x2xf32>
    %8 = vector.extract_strided_slice %1 {offsets = [0, 0, 0], sizes = [1, 8, 2], strides = [1, 1, 1]} : vector<9x8x4xf32> to vector<1x8x2xf32>
    %9 = vector.extract_strided_slice %6 {offsets = [1, 0, 0], sizes = [8, 8, 2], strides = [1, 1, 1]} : vector<9x8x2xf32> to vector<8x8x2xf32>
    %10 = vector.extract_strided_slice %6 {offsets = [0, 0, 0], sizes = [8, 8, 2], strides = [1, 1, 1]} : vector<9x8x2xf32> to vector<8x8x2xf32>
    %11 = arith.subf %9, %10 : vector<8x8x2xf32>
    %12 = tpu.concatenate %8, %11 in 0 : vector<1x8x2xf32>, vector<8x8x2xf32> -> vector<9x8x2xf32>
    %cst_5 = arith.constant 0.000000e+00 : f32
    %13 = vector.broadcast %cst_5 : f32 to vector<1x8x2xf32>
    %14 = vector.extract_strided_slice %7 {offsets = [1, 0, 0], sizes = [8, 8, 2], strides = [1, 1, 1]} : vector<9x8x2xf32> to vector<8x8x2xf32>
    %cst_6 = arith.constant 9.99999997E-7 : f32
    %15 = vector.broadcast %cst_6 : f32 to vector<8x8x2xf32>
    %16 = arith.addf %14, %15 : vector<8x8x2xf32>
    %17 = vector.extract_strided_slice %7 {offsets = [0, 0, 0], sizes = [8, 8, 2], strides = [1, 1, 1]} : vector<9x8x2xf32> to vector<8x8x2xf32>
    %cst_7 = arith.constant 9.99999997E-7 : f32
    %18 = vector.broadcast %cst_7 : f32 to vector<8x8x2xf32>
    %19 = arith.addf %17, %18 : vector<8x8x2xf32>
    %20 = arith.divf %16, %19 : vector<8x8x2xf32>
    %21 = math.log %20 : vector<8x8x2xf32>
    %22 = tpu.concatenate %13, %21 in 0 : vector<1x8x2xf32>, vector<8x8x2xf32> -> vector<9x8x2xf32>
    %23 = vector.extract_strided_slice %12 {offsets = [1, 0, 0], sizes = [1, 8, 2], strides = [1, 1, 1]} : vector<9x8x2xf32> to vector<1x8x2xf32>
    %24 = vector.shape_cast %23 : vector<1x8x2xf32> to vector<8x2xf32>
    %25 = vector.extract_strided_slice %22 {offsets = [1, 0, 0], sizes = [1, 8, 2], strides = [1, 1, 1]} : vector<9x8x2xf32> to vector<1x8x2xf32>
    %26 = vector.shape_cast %25 : vector<1x8x2xf32> to vector<8x2xf32>
    %27 = tpu.concatenate %24, %26 in 1 : vector<8x2xf32>, vector<8x2xf32> -> vector<8x4xf32>
    %28 = vector.extract_strided_slice %12 {offsets = [2, 0, 0], sizes = [1, 8, 2], strides = [1, 1, 1]} : vector<9x8x2xf32> to vector<1x8x2xf32>
    %29 = vector.shape_cast %28 : vector<1x8x2xf32> to vector<8x2xf32>
    %30 = vector.extract_strided_slice %22 {offsets = [2, 0, 0], sizes = [1, 8, 2], strides = [1, 1, 1]} : vector<9x8x2xf32> to vector<1x8x2xf32>
    %31 = vector.shape_cast %30 : vector<1x8x2xf32> to vector<8x2xf32>
    %32 = tpu.concatenate %29, %31 in 1 : vector<8x2xf32>, vector<8x2xf32> -> vector<8x4xf32>
    %33 = vector.extract_strided_slice %12 {offsets = [3, 0, 0], sizes = [1, 8, 2], strides = [1, 1, 1]} : vector<9x8x2xf32> to vector<1x8x2xf32>
    %34 = vector.shape_cast %33 : vector<1x8x2xf32> to vector<8x2xf32>
    %35 = vector.extract_strided_slice %22 {offsets = [3, 0, 0], sizes = [1, 8, 2], strides = [1, 1, 1]} : vector<9x8x2xf32> to vector<1x8x2xf32>
    %36 = vector.shape_cast %35 : vector<1x8x2xf32> to vector<8x2xf32>
    %37 = tpu.concatenate %34, %36 in 1 : vector<8x2xf32>, vector<8x2xf32> -> vector<8x4xf32>
    %38 = vector.extract_strided_slice %12 {offsets = [4, 0, 0], sizes = [1, 8, 2], strides = [1, 1, 1]} : vector<9x8x2xf32> to vector<1x8x2xf32>
    %39 = vector.shape_cast %38 : vector<1x8x2xf32> to vector<8x2xf32>
    %40 = vector.extract_strided_slice %22 {offsets = [4, 0, 0], sizes = [1, 8, 2], strides = [1, 1, 1]} : vector<9x8x2xf32> to vector<1x8x2xf32>
    %41 = vector.shape_cast %40 : vector<1x8x2xf32> to vector<8x2xf32>
    %42 = tpu.concatenate %39, %41 in 1 : vector<8x2xf32>, vector<8x2xf32> -> vector<8x4xf32>
    %43 = vector.extract_strided_slice %12 {offsets = [5, 0, 0], sizes = [1, 8, 2], strides = [1, 1, 1]} : vector<9x8x2xf32> to vector<1x8x2xf32>
    %44 = vector.shape_cast %43 : vector<1x8x2xf32> to vector<8x2xf32>
    %45 = vector.extract_strided_slice %22 {offsets = [5, 0, 0], sizes = [1, 8, 2], strides = [1, 1, 1]} : vector<9x8x2xf32> to vector<1x8x2xf32>
    %46 = vector.shape_cast %45 : vector<1x8x2xf32> to vector<8x2xf32>
    %47 = tpu.concatenate %44, %46 in 1 : vector<8x2xf32>, vector<8x2xf32> -> vector<8x4xf32>
    %48 = vector.extract_strided_slice %12 {offsets = [6, 0, 0], sizes = [1, 8, 2], strides = [1, 1, 1]} : vector<9x8x2xf32> to vector<1x8x2xf32>
    %49 = vector.shape_cast %48 : vector<1x8x2xf32> to vector<8x2xf32>
    %50 = vector.extract_strided_slice %22 {offsets = [6, 0, 0], sizes = [1, 8, 2], strides = [1, 1, 1]} : vector<9x8x2xf32> to vector<1x8x2xf32>
    %51 = vector.shape_cast %50 : vector<1x8x2xf32> to vector<8x2xf32>
    %52 = tpu.concatenate %49, %51 in 1 : vector<8x2xf32>, vector<8x2xf32> -> vector<8x4xf32>
    %53 = vector.extract_strided_slice %12 {offsets = [7, 0, 0], sizes = [1, 8, 2], strides = [1, 1, 1]} : vector<9x8x2xf32> to vector<1x8x2xf32>
    %54 = vector.shape_cast %53 : vector<1x8x2xf32> to vector<8x2xf32>
    %55 = vector.extract_strided_slice %22 {offsets = [7, 0, 0], sizes = [1, 8, 2], strides = [1, 1, 1]} : vector<9x8x2xf32> to vector<1x8x2xf32>
    %56 = vector.shape_cast %55 : vector<1x8x2xf32> to vector<8x2xf32>
    %57 = tpu.concatenate %54, %56 in 1 : vector<8x2xf32>, vector<8x2xf32> -> vector<8x4xf32>
    %58 = vector.extract_strided_slice %12 {offsets = [8, 0, 0], sizes = [1, 8, 2], strides = [1, 1, 1]} : vector<9x8x2xf32> to vector<1x8x2xf32>
    %59 = vector.shape_cast %58 : vector<1x8x2xf32> to vector<8x2xf32>
    %60 = vector.extract_strided_slice %22 {offsets = [8, 0, 0], sizes = [1, 8, 2], strides = [1, 1, 1]} : vector<9x8x2xf32> to vector<1x8x2xf32>
    %61 = vector.shape_cast %60 : vector<1x8x2xf32> to vector<8x2xf32>
    %62 = tpu.concatenate %59, %61 in 1 : vector<8x2xf32>, vector<8x2xf32> -> vector<8x4xf32>
    %63 = tpu.concatenate %27, %32, %37, %42, %47, %52, %57, %62 in 0 : vector<8x4xf32>, vector<8x4xf32>, vector<8x4xf32>, vector<8x4xf32>, vector<8x4xf32>, vector<8x4xf32>, vector<8x4xf32>, vector<8x4xf32> -> vector<64x4xf32>
    %c0_8 = arith.constant 0 : index
    %c0_9 = arith.constant 0 : index
    %64 = vector.load %arg4[%c0_8, %c0_9] : memref<4x16xf32, #tpu.memory_space<vmem>>, vector<4x16xf32>
    %cst_10 = arith.constant dense<0.000000e+00> : vector<64x16xf32>
    %65 = tpu.matmul %63, %64, %cst_10 {dimension_numbers = #tpu.dot_dimension_numbers<[1], [0], [0], [1], [0, 0, 1, 1], [], []>} : vector<64x4xf32>, vector<4x16xf32>, vector<64x16xf32> -> vector<64x16xf32>
    %c0_11 = arith.constant 0 : index
    %c0_12 = arith.constant 0 : index
    %66 = vector.load %arg5[%c0_11, %c0_12] : memref<1x16xf32, #tpu.memory_space<vmem>>, vector<1x16xf32>
    %67 = vector.broadcast %66 : vector<1x16xf32> to vector<64x16xf32>
    %68 = arith.addf %65, %67 : vector<64x16xf32>
    %c0_13 = arith.constant 0 : index
    %c0_14 = arith.constant 0 : index
    %69 = vector.load %arg6[%c0_13, %c0_14] : memref<16x64xf32, #tpu.memory_space<vmem>>, vector<16x64xf32>
    %cst_15 = arith.constant dense<0.000000e+00> : vector<64x64xf32>
    %70 = tpu.matmul %68, %69, %cst_15 {dimension_numbers = #tpu.dot_dimension_numbers<[1], [0], [0], [1], [0, 0, 1, 1], [], []>} : vector<64x16xf32>, vector<16x64xf32>, vector<64x64xf32> -> vector<64x64xf32>
    %c0_16 = arith.constant 0 : index
    %c0_17 = arith.constant 0 : index
    %71 = vector.load %arg8[%c0_16, %c0_17] : memref<1x64xf32, #tpu.memory_space<vmem>>, vector<1x64xf32>
    %72 = vector.broadcast %71 : vector<1x64xf32> to vector<64x64xf32>
    %73 = arith.addf %70, %72 : vector<64x64xf32>
    %c0_18 = arith.constant 0 : index
    %c0_19 = arith.constant 0 : index
    %74 = vector.load %arg7[%c0_18, %c0_19] : memref<16x64xf32, #tpu.memory_space<vmem>>, vector<16x64xf32>
    %cst_20 = arith.constant 0.000000e+00 : f32
    %75 = vector.broadcast %cst_20 : f32 to vector<8x16xf32>
    %cst_21 = arith.constant 0.000000e+00 : f32
    %76 = vector.broadcast %cst_21 : f32 to vector<8x16xf32>
    %77 = vector.extract_strided_slice %73 {offsets = [0, 0], sizes = [8, 64], strides = [1, 1]} : vector<64x64xf32> to vector<8x64xf32>
    %cst_22 = arith.constant dense<0.000000e+00> : vector<8x64xf32>
    %78 = tpu.matmul %75, %74, %cst_22 {dimension_numbers = #tpu.dot_dimension_numbers<[1], [0], [0], [1], [0, 0, 1, 1], [], []>} : vector<8x16xf32>, vector<16x64xf32>, vector<8x64xf32> -> vector<8x64xf32>
    %79 = arith.addf %77, %78 : vector<8x64xf32>
    %80 = vector.extract_strided_slice %79 {offsets = [0, 0], sizes = [8, 16], strides = [1, 1]} : vector<8x64xf32> to vector<8x16xf32>
    %81 = arith.negf %80 : vector<8x16xf32>
    %82 = math.exp %81 : vector<8x16xf32>
    %cst_23 = arith.constant 1.000000e+00 : f32
    %83 = vector.broadcast %cst_23 : f32 to vector<8x16xf32>
    %84 = arith.addf %83, %82 : vector<8x16xf32>
    %85 = arith.divf %83, %84 : vector<8x16xf32>
    %86 = vector.extract_strided_slice %79 {offsets = [0, 16], sizes = [8, 16], strides = [1, 1]} : vector<8x64xf32> to vector<8x16xf32>
    %87 = arith.negf %86 : vector<8x16xf32>
    %88 = math.exp %87 : vector<8x16xf32>
    %cst_24 = arith.constant 1.000000e+00 : f32
    %89 = vector.broadcast %cst_24 : f32 to vector<8x16xf32>
    %90 = arith.addf %89, %88 : vector<8x16xf32>
    %91 = arith.divf %89, %90 : vector<8x16xf32>
    %92 = vector.extract_strided_slice %79 {offsets = [0, 32], sizes = [8, 16], strides = [1, 1]} : vector<8x64xf32> to vector<8x16xf32>
    %93 = math.tanh %92 : vector<8x16xf32>
    %94 = vector.extract_strided_slice %79 {offsets = [0, 48], sizes = [8, 16], strides = [1, 1]} : vector<8x64xf32> to vector<8x16xf32>
    %95 = arith.negf %94 : vector<8x16xf32>
    %96 = math.exp %95 : vector<8x16xf32>
    %cst_25 = arith.constant 1.000000e+00 : f32
    %97 = vector.broadcast %cst_25 : f32 to vector<8x16xf32>
    %98 = arith.addf %97, %96 : vector<8x16xf32>
    %99 = arith.divf %97, %98 : vector<8x16xf32>
    %100 = arith.mulf %91, %76 : vector<8x16xf32>
    %101 = arith.mulf %85, %93 : vector<8x16xf32>
    %102 = arith.addf %100, %101 : vector<8x16xf32>
    %103 = math.tanh %102 : vector<8x16xf32>
    %104 = arith.mulf %99, %103 : vector<8x16xf32>
    %105 = vector.extract_strided_slice %73 {offsets = [8, 0], sizes = [8, 64], strides = [1, 1]} : vector<64x64xf32> to vector<8x64xf32>
    %cst_26 = arith.constant dense<0.000000e+00> : vector<8x64xf32>
    %106 = tpu.matmul %104, %74, %cst_26 {dimension_numbers = #tpu.dot_dimension_numbers<[1], [0], [0], [1], [0, 0, 1, 1], [], []>} : vector<8x16xf32>, vector<16x64xf32>, vector<8x64xf32> -> vector<8x64xf32>
    %107 = arith.addf %105, %106 : vector<8x64xf32>
    %108 = vector.extract_strided_slice %107 {offsets = [0, 0], sizes = [8, 16], strides = [1, 1]} : vector<8x64xf32> to vector<8x16xf32>
    %109 = arith.negf %108 : vector<8x16xf32>
    %110 = math.exp %109 : vector<8x16xf32>
    %cst_27 = arith.constant 1.000000e+00 : f32
    %111 = vector.broadcast %cst_27 : f32 to vector<8x16xf32>
    %112 = arith.addf %111, %110 : vector<8x16xf32>
    %113 = arith.divf %111, %112 : vector<8x16xf32>
    %114 = vector.extract_strided_slice %107 {offsets = [0, 16], sizes = [8, 16], strides = [1, 1]} : vector<8x64xf32> to vector<8x16xf32>
    %115 = arith.negf %114 : vector<8x16xf32>
    %116 = math.exp %115 : vector<8x16xf32>
    %cst_28 = arith.constant 1.000000e+00 : f32
    %117 = vector.broadcast %cst_28 : f32 to vector<8x16xf32>
    %118 = arith.addf %117, %116 : vector<8x16xf32>
    %119 = arith.divf %117, %118 : vector<8x16xf32>
    %120 = vector.extract_strided_slice %107 {offsets = [0, 32], sizes = [8, 16], strides = [1, 1]} : vector<8x64xf32> to vector<8x16xf32>
    %121 = math.tanh %120 : vector<8x16xf32>
    %122 = vector.extract_strided_slice %107 {offsets = [0, 48], sizes = [8, 16], strides = [1, 1]} : vector<8x64xf32> to vector<8x16xf32>
    %123 = arith.negf %122 : vector<8x16xf32>
    %124 = math.exp %123 : vector<8x16xf32>
    %cst_29 = arith.constant 1.000000e+00 : f32
    %125 = vector.broadcast %cst_29 : f32 to vector<8x16xf32>
    %126 = arith.addf %125, %124 : vector<8x16xf32>
    %127 = arith.divf %125, %126 : vector<8x16xf32>
    %128 = arith.mulf %119, %102 : vector<8x16xf32>
    %129 = arith.mulf %113, %121 : vector<8x16xf32>
    %130 = arith.addf %128, %129 : vector<8x16xf32>
    %131 = math.tanh %130 : vector<8x16xf32>
    %132 = arith.mulf %127, %131 : vector<8x16xf32>
    %133 = vector.extract_strided_slice %73 {offsets = [16, 0], sizes = [8, 64], strides = [1, 1]} : vector<64x64xf32> to vector<8x64xf32>
    %cst_30 = arith.constant dense<0.000000e+00> : vector<8x64xf32>
    %134 = tpu.matmul %132, %74, %cst_30 {dimension_numbers = #tpu.dot_dimension_numbers<[1], [0], [0], [1], [0, 0, 1, 1], [], []>} : vector<8x16xf32>, vector<16x64xf32>, vector<8x64xf32> -> vector<8x64xf32>
    %135 = arith.addf %133, %134 : vector<8x64xf32>
    %136 = vector.extract_strided_slice %135 {offsets = [0, 0], sizes = [8, 16], strides = [1, 1]} : vector<8x64xf32> to vector<8x16xf32>
    %137 = arith.negf %136 : vector<8x16xf32>
    %138 = math.exp %137 : vector<8x16xf32>
    %cst_31 = arith.constant 1.000000e+00 : f32
    %139 = vector.broadcast %cst_31 : f32 to vector<8x16xf32>
    %140 = arith.addf %139, %138 : vector<8x16xf32>
    %141 = arith.divf %139, %140 : vector<8x16xf32>
    %142 = vector.extract_strided_slice %135 {offsets = [0, 16], sizes = [8, 16], strides = [1, 1]} : vector<8x64xf32> to vector<8x16xf32>
    %143 = arith.negf %142 : vector<8x16xf32>
    %144 = math.exp %143 : vector<8x16xf32>
    %cst_32 = arith.constant 1.000000e+00 : f32
    %145 = vector.broadcast %cst_32 : f32 to vector<8x16xf32>
    %146 = arith.addf %145, %144 : vector<8x16xf32>
    %147 = arith.divf %145, %146 : vector<8x16xf32>
    %148 = vector.extract_strided_slice %135 {offsets = [0, 32], sizes = [8, 16], strides = [1, 1]} : vector<8x64xf32> to vector<8x16xf32>
    %149 = math.tanh %148 : vector<8x16xf32>
    %150 = vector.extract_strided_slice %135 {offsets = [0, 48], sizes = [8, 16], strides = [1, 1]} : vector<8x64xf32> to vector<8x16xf32>
    %151 = arith.negf %150 : vector<8x16xf32>
    %152 = math.exp %151 : vector<8x16xf32>
    %cst_33 = arith.constant 1.000000e+00 : f32
    %153 = vector.broadcast %cst_33 : f32 to vector<8x16xf32>
    %154 = arith.addf %153, %152 : vector<8x16xf32>
    %155 = arith.divf %153, %154 : vector<8x16xf32>
    %156 = arith.mulf %147, %130 : vector<8x16xf32>
    %157 = arith.mulf %141, %149 : vector<8x16xf32>
    %158 = arith.addf %156, %157 : vector<8x16xf32>
    %159 = math.tanh %158 : vector<8x16xf32>
    %160 = arith.mulf %155, %159 : vector<8x16xf32>
    %161 = vector.extract_strided_slice %73 {offsets = [24, 0], sizes = [8, 64], strides = [1, 1]} : vector<64x64xf32> to vector<8x64xf32>
    %cst_34 = arith.constant dense<0.000000e+00> : vector<8x64xf32>
    %162 = tpu.matmul %160, %74, %cst_34 {dimension_numbers = #tpu.dot_dimension_numbers<[1], [0], [0], [1], [0, 0, 1, 1], [], []>} : vector<8x16xf32>, vector<16x64xf32>, vector<8x64xf32> -> vector<8x64xf32>
    %163 = arith.addf %161, %162 : vector<8x64xf32>
    %164 = vector.extract_strided_slice %163 {offsets = [0, 0], sizes = [8, 16], strides = [1, 1]} : vector<8x64xf32> to vector<8x16xf32>
    %165 = arith.negf %164 : vector<8x16xf32>
    %166 = math.exp %165 : vector<8x16xf32>
    %cst_35 = arith.constant 1.000000e+00 : f32
    %167 = vector.broadcast %cst_35 : f32 to vector<8x16xf32>
    %168 = arith.addf %167, %166 : vector<8x16xf32>
    %169 = arith.divf %167, %168 : vector<8x16xf32>
    %170 = vector.extract_strided_slice %163 {offsets = [0, 16], sizes = [8, 16], strides = [1, 1]} : vector<8x64xf32> to vector<8x16xf32>
    %171 = arith.negf %170 : vector<8x16xf32>
    %172 = math.exp %171 : vector<8x16xf32>
    %cst_36 = arith.constant 1.000000e+00 : f32
    %173 = vector.broadcast %cst_36 : f32 to vector<8x16xf32>
    %174 = arith.addf %173, %172 : vector<8x16xf32>
    %175 = arith.divf %173, %174 : vector<8x16xf32>
    %176 = vector.extract_strided_slice %163 {offsets = [0, 32], sizes = [8, 16], strides = [1, 1]} : vector<8x64xf32> to vector<8x16xf32>
    %177 = math.tanh %176 : vector<8x16xf32>
    %178 = vector.extract_strided_slice %163 {offsets = [0, 48], sizes = [8, 16], strides = [1, 1]} : vector<8x64xf32> to vector<8x16xf32>
    %179 = arith.negf %178 : vector<8x16xf32>
    %180 = math.exp %179 : vector<8x16xf32>
    %cst_37 = arith.constant 1.000000e+00 : f32
    %181 = vector.broadcast %cst_37 : f32 to vector<8x16xf32>
    %182 = arith.addf %181, %180 : vector<8x16xf32>
    %183 = arith.divf %181, %182 : vector<8x16xf32>
    %184 = arith.mulf %175, %158 : vector<8x16xf32>
    %185 = arith.mulf %169, %177 : vector<8x16xf32>
    %186 = arith.addf %184, %185 : vector<8x16xf32>
    %187 = math.tanh %186 : vector<8x16xf32>
    %188 = arith.mulf %183, %187 : vector<8x16xf32>
    %189 = vector.extract_strided_slice %73 {offsets = [32, 0], sizes = [8, 64], strides = [1, 1]} : vector<64x64xf32> to vector<8x64xf32>
    %cst_38 = arith.constant dense<0.000000e+00> : vector<8x64xf32>
    %190 = tpu.matmul %188, %74, %cst_38 {dimension_numbers = #tpu.dot_dimension_numbers<[1], [0], [0], [1], [0, 0, 1, 1], [], []>} : vector<8x16xf32>, vector<16x64xf32>, vector<8x64xf32> -> vector<8x64xf32>
    %191 = arith.addf %189, %190 : vector<8x64xf32>
    %192 = vector.extract_strided_slice %191 {offsets = [0, 0], sizes = [8, 16], strides = [1, 1]} : vector<8x64xf32> to vector<8x16xf32>
    %193 = arith.negf %192 : vector<8x16xf32>
    %194 = math.exp %193 : vector<8x16xf32>
    %cst_39 = arith.constant 1.000000e+00 : f32
    %195 = vector.broadcast %cst_39 : f32 to vector<8x16xf32>
    %196 = arith.addf %195, %194 : vector<8x16xf32>
    %197 = arith.divf %195, %196 : vector<8x16xf32>
    %198 = vector.extract_strided_slice %191 {offsets = [0, 16], sizes = [8, 16], strides = [1, 1]} : vector<8x64xf32> to vector<8x16xf32>
    %199 = arith.negf %198 : vector<8x16xf32>
    %200 = math.exp %199 : vector<8x16xf32>
    %cst_40 = arith.constant 1.000000e+00 : f32
    %201 = vector.broadcast %cst_40 : f32 to vector<8x16xf32>
    %202 = arith.addf %201, %200 : vector<8x16xf32>
    %203 = arith.divf %201, %202 : vector<8x16xf32>
    %204 = vector.extract_strided_slice %191 {offsets = [0, 32], sizes = [8, 16], strides = [1, 1]} : vector<8x64xf32> to vector<8x16xf32>
    %205 = math.tanh %204 : vector<8x16xf32>
    %206 = vector.extract_strided_slice %191 {offsets = [0, 48], sizes = [8, 16], strides = [1, 1]} : vector<8x64xf32> to vector<8x16xf32>
    %207 = arith.negf %206 : vector<8x16xf32>
    %208 = math.exp %207 : vector<8x16xf32>
    %cst_41 = arith.constant 1.000000e+00 : f32
    %209 = vector.broadcast %cst_41 : f32 to vector<8x16xf32>
    %210 = arith.addf %209, %208 : vector<8x16xf32>
    %211 = arith.divf %209, %210 : vector<8x16xf32>
    %212 = arith.mulf %203, %186 : vector<8x16xf32>
    %213 = arith.mulf %197, %205 : vector<8x16xf32>
    %214 = arith.addf %212, %213 : vector<8x16xf32>
    %215 = math.tanh %214 : vector<8x16xf32>
    %216 = arith.mulf %211, %215 : vector<8x16xf32>
    %217 = vector.extract_strided_slice %73 {offsets = [40, 0], sizes = [8, 64], strides = [1, 1]} : vector<64x64xf32> to vector<8x64xf32>
    %cst_42 = arith.constant dense<0.000000e+00> : vector<8x64xf32>
    %218 = tpu.matmul %216, %74, %cst_42 {dimension_numbers = #tpu.dot_dimension_numbers<[1], [0], [0], [1], [0, 0, 1, 1], [], []>} : vector<8x16xf32>, vector<16x64xf32>, vector<8x64xf32> -> vector<8x64xf32>
    %219 = arith.addf %217, %218 : vector<8x64xf32>
    %220 = vector.extract_strided_slice %219 {offsets = [0, 0], sizes = [8, 16], strides = [1, 1]} : vector<8x64xf32> to vector<8x16xf32>
    %221 = arith.negf %220 : vector<8x16xf32>
    %222 = math.exp %221 : vector<8x16xf32>
    %cst_43 = arith.constant 1.000000e+00 : f32
    %223 = vector.broadcast %cst_43 : f32 to vector<8x16xf32>
    %224 = arith.addf %223, %222 : vector<8x16xf32>
    %225 = arith.divf %223, %224 : vector<8x16xf32>
    %226 = vector.extract_strided_slice %219 {offsets = [0, 16], sizes = [8, 16], strides = [1, 1]} : vector<8x64xf32> to vector<8x16xf32>
    %227 = arith.negf %226 : vector<8x16xf32>
    %228 = math.exp %227 : vector<8x16xf32>
    %cst_44 = arith.constant 1.000000e+00 : f32
    %229 = vector.broadcast %cst_44 : f32 to vector<8x16xf32>
    %230 = arith.addf %229, %228 : vector<8x16xf32>
    %231 = arith.divf %229, %230 : vector<8x16xf32>
    %232 = vector.extract_strided_slice %219 {offsets = [0, 32], sizes = [8, 16], strides = [1, 1]} : vector<8x64xf32> to vector<8x16xf32>
    %233 = math.tanh %232 : vector<8x16xf32>
    %234 = vector.extract_strided_slice %219 {offsets = [0, 48], sizes = [8, 16], strides = [1, 1]} : vector<8x64xf32> to vector<8x16xf32>
    %235 = arith.negf %234 : vector<8x16xf32>
    %236 = math.exp %235 : vector<8x16xf32>
    %cst_45 = arith.constant 1.000000e+00 : f32
    %237 = vector.broadcast %cst_45 : f32 to vector<8x16xf32>
    %238 = arith.addf %237, %236 : vector<8x16xf32>
    %239 = arith.divf %237, %238 : vector<8x16xf32>
    %240 = arith.mulf %231, %214 : vector<8x16xf32>
    %241 = arith.mulf %225, %233 : vector<8x16xf32>
    %242 = arith.addf %240, %241 : vector<8x16xf32>
    %243 = math.tanh %242 : vector<8x16xf32>
    %244 = arith.mulf %239, %243 : vector<8x16xf32>
    %245 = vector.extract_strided_slice %73 {offsets = [48, 0], sizes = [8, 64], strides = [1, 1]} : vector<64x64xf32> to vector<8x64xf32>
    %cst_46 = arith.constant dense<0.000000e+00> : vector<8x64xf32>
    %246 = tpu.matmul %244, %74, %cst_46 {dimension_numbers = #tpu.dot_dimension_numbers<[1], [0], [0], [1], [0, 0, 1, 1], [], []>} : vector<8x16xf32>, vector<16x64xf32>, vector<8x64xf32> -> vector<8x64xf32>
    %247 = arith.addf %245, %246 : vector<8x64xf32>
    %248 = vector.extract_strided_slice %247 {offsets = [0, 0], sizes = [8, 16], strides = [1, 1]} : vector<8x64xf32> to vector<8x16xf32>
    %249 = arith.negf %248 : vector<8x16xf32>
    %250 = math.exp %249 : vector<8x16xf32>
    %cst_47 = arith.constant 1.000000e+00 : f32
    %251 = vector.broadcast %cst_47 : f32 to vector<8x16xf32>
    %252 = arith.addf %251, %250 : vector<8x16xf32>
    %253 = arith.divf %251, %252 : vector<8x16xf32>
    %254 = vector.extract_strided_slice %247 {offsets = [0, 16], sizes = [8, 16], strides = [1, 1]} : vector<8x64xf32> to vector<8x16xf32>
    %255 = arith.negf %254 : vector<8x16xf32>
    %256 = math.exp %255 : vector<8x16xf32>
    %cst_48 = arith.constant 1.000000e+00 : f32
    %257 = vector.broadcast %cst_48 : f32 to vector<8x16xf32>
    %258 = arith.addf %257, %256 : vector<8x16xf32>
    %259 = arith.divf %257, %258 : vector<8x16xf32>
    %260 = vector.extract_strided_slice %247 {offsets = [0, 32], sizes = [8, 16], strides = [1, 1]} : vector<8x64xf32> to vector<8x16xf32>
    %261 = math.tanh %260 : vector<8x16xf32>
    %262 = vector.extract_strided_slice %247 {offsets = [0, 48], sizes = [8, 16], strides = [1, 1]} : vector<8x64xf32> to vector<8x16xf32>
    %263 = arith.negf %262 : vector<8x16xf32>
    %264 = math.exp %263 : vector<8x16xf32>
    %cst_49 = arith.constant 1.000000e+00 : f32
    %265 = vector.broadcast %cst_49 : f32 to vector<8x16xf32>
    %266 = arith.addf %265, %264 : vector<8x16xf32>
    %267 = arith.divf %265, %266 : vector<8x16xf32>
    %268 = arith.mulf %259, %242 : vector<8x16xf32>
    %269 = arith.mulf %253, %261 : vector<8x16xf32>
    %270 = arith.addf %268, %269 : vector<8x16xf32>
    %271 = math.tanh %270 : vector<8x16xf32>
    %272 = arith.mulf %267, %271 : vector<8x16xf32>
    %273 = vector.extract_strided_slice %73 {offsets = [56, 0], sizes = [8, 64], strides = [1, 1]} : vector<64x64xf32> to vector<8x64xf32>
    %cst_50 = arith.constant dense<0.000000e+00> : vector<8x64xf32>
    %274 = tpu.matmul %272, %74, %cst_50 {dimension_numbers = #tpu.dot_dimension_numbers<[1], [0], [0], [1], [0, 0, 1, 1], [], []>} : vector<8x16xf32>, vector<16x64xf32>, vector<8x64xf32> -> vector<8x64xf32>
    %275 = arith.addf %273, %274 : vector<8x64xf32>
    %276 = vector.extract_strided_slice %275 {offsets = [0, 0], sizes = [8, 16], strides = [1, 1]} : vector<8x64xf32> to vector<8x16xf32>
    %277 = arith.negf %276 : vector<8x16xf32>
    %278 = math.exp %277 : vector<8x16xf32>
    %cst_51 = arith.constant 1.000000e+00 : f32
    %279 = vector.broadcast %cst_51 : f32 to vector<8x16xf32>
    %280 = arith.addf %279, %278 : vector<8x16xf32>
    %281 = arith.divf %279, %280 : vector<8x16xf32>
    %282 = vector.extract_strided_slice %275 {offsets = [0, 16], sizes = [8, 16], strides = [1, 1]} : vector<8x64xf32> to vector<8x16xf32>
    %283 = arith.negf %282 : vector<8x16xf32>
    %284 = math.exp %283 : vector<8x16xf32>
    %cst_52 = arith.constant 1.000000e+00 : f32
    %285 = vector.broadcast %cst_52 : f32 to vector<8x16xf32>
    %286 = arith.addf %285, %284 : vector<8x16xf32>
    %287 = arith.divf %285, %286 : vector<8x16xf32>
    %288 = vector.extract_strided_slice %275 {offsets = [0, 32], sizes = [8, 16], strides = [1, 1]} : vector<8x64xf32> to vector<8x16xf32>
    %289 = math.tanh %288 : vector<8x16xf32>
    %290 = vector.extract_strided_slice %275 {offsets = [0, 48], sizes = [8, 16], strides = [1, 1]} : vector<8x64xf32> to vector<8x16xf32>
    %291 = arith.negf %290 : vector<8x16xf32>
    %292 = math.exp %291 : vector<8x16xf32>
    %cst_53 = arith.constant 1.000000e+00 : f32
    %293 = vector.broadcast %cst_53 : f32 to vector<8x16xf32>
    %294 = arith.addf %293, %292 : vector<8x16xf32>
    %295 = arith.divf %293, %294 : vector<8x16xf32>
    %296 = arith.mulf %287, %270 : vector<8x16xf32>
    %297 = arith.mulf %281, %289 : vector<8x16xf32>
    %298 = arith.addf %296, %297 : vector<8x16xf32>
    %299 = math.tanh %298 : vector<8x16xf32>
    %300 = arith.mulf %295, %299 : vector<8x16xf32>
    %301 = vector.extract_strided_slice %6 {offsets = [0, 0, 0], sizes = [8, 8, 2], strides = [1, 1, 1]} : vector<9x8x2xf32> to vector<8x8x2xf32>
    %302 = vector.extract_strided_slice %7 {offsets = [0, 0, 0], sizes = [8, 8, 2], strides = [1, 1, 1]} : vector<9x8x2xf32> to vector<8x8x2xf32>
    %cst_54 = arith.constant 9.99999997E-7 : f32
    %303 = vector.broadcast %cst_54 : f32 to vector<8x8x2xf32>
    %304 = arith.addf %301, %303 : vector<8x8x2xf32>
    %305 = arith.divf %302, %304 : vector<8x8x2xf32>
    %306 = arith.addf %301, %302 : vector<8x8x2xf32>
    %307 = vector.extract_strided_slice %301 {offsets = [1, 0, 0], sizes = [7, 8, 2], strides = [1, 1, 1]} : vector<8x8x2xf32> to vector<7x8x2xf32>
    %308 = vector.extract_strided_slice %301 {offsets = [0, 0, 0], sizes = [7, 8, 2], strides = [1, 1, 1]} : vector<8x8x2xf32> to vector<7x8x2xf32>
    %309 = arith.subf %307, %308 : vector<7x8x2xf32>
    %310 = vector.extract_strided_slice %306 {offsets = [1, 0, 0], sizes = [7, 8, 2], strides = [1, 1, 1]} : vector<8x8x2xf32> to vector<7x8x2xf32>
    %311 = vector.extract_strided_slice %306 {offsets = [0, 0, 0], sizes = [7, 8, 2], strides = [1, 1, 1]} : vector<8x8x2xf32> to vector<7x8x2xf32>
    %312 = arith.subf %310, %311 : vector<7x8x2xf32>
    %313 = vector.extract_strided_slice %305 {offsets = [0, 0, 0], sizes = [1, 8, 2], strides = [1, 1, 1]} : vector<8x8x2xf32> to vector<1x8x2xf32>
    %314 = vector.shape_cast %313 : vector<1x8x2xf32> to vector<8x2xf32>
    %315 = vector.extract_strided_slice %305 {offsets = [1, 0, 0], sizes = [1, 8, 2], strides = [1, 1, 1]} : vector<8x8x2xf32> to vector<1x8x2xf32>
    %316 = vector.shape_cast %315 : vector<1x8x2xf32> to vector<8x2xf32>
    %317 = vector.extract_strided_slice %305 {offsets = [2, 0, 0], sizes = [1, 8, 2], strides = [1, 1, 1]} : vector<8x8x2xf32> to vector<1x8x2xf32>
    %318 = vector.shape_cast %317 : vector<1x8x2xf32> to vector<8x2xf32>
    %319 = vector.extract_strided_slice %305 {offsets = [3, 0, 0], sizes = [1, 8, 2], strides = [1, 1, 1]} : vector<8x8x2xf32> to vector<1x8x2xf32>
    %320 = vector.shape_cast %319 : vector<1x8x2xf32> to vector<8x2xf32>
    %321 = vector.extract_strided_slice %305 {offsets = [4, 0, 0], sizes = [1, 8, 2], strides = [1, 1, 1]} : vector<8x8x2xf32> to vector<1x8x2xf32>
    %322 = vector.shape_cast %321 : vector<1x8x2xf32> to vector<8x2xf32>
    %323 = vector.extract_strided_slice %305 {offsets = [5, 0, 0], sizes = [1, 8, 2], strides = [1, 1, 1]} : vector<8x8x2xf32> to vector<1x8x2xf32>
    %324 = vector.shape_cast %323 : vector<1x8x2xf32> to vector<8x2xf32>
    %325 = vector.extract_strided_slice %305 {offsets = [6, 0, 0], sizes = [1, 8, 2], strides = [1, 1, 1]} : vector<8x8x2xf32> to vector<1x8x2xf32>
    %326 = vector.shape_cast %325 : vector<1x8x2xf32> to vector<8x2xf32>
    %327 = vector.extract_strided_slice %305 {offsets = [7, 0, 0], sizes = [1, 8, 2], strides = [1, 1, 1]} : vector<8x8x2xf32> to vector<1x8x2xf32>
    %328 = vector.shape_cast %327 : vector<1x8x2xf32> to vector<8x2xf32>
    %329 = tpu.concatenate %314, %316, %318, %320, %322, %324, %326, %328 in 1 : vector<8x2xf32>, vector<8x2xf32>, vector<8x2xf32>, vector<8x2xf32>, vector<8x2xf32>, vector<8x2xf32>, vector<8x2xf32>, vector<8x2xf32> -> vector<8x16xf32>
    %330 = vector.extract_strided_slice %309 {offsets = [0, 0, 0], sizes = [1, 8, 2], strides = [1, 1, 1]} : vector<7x8x2xf32> to vector<1x8x2xf32>
    %331 = vector.shape_cast %330 : vector<1x8x2xf32> to vector<8x2xf32>
    %332 = vector.extract_strided_slice %312 {offsets = [0, 0, 0], sizes = [1, 8, 2], strides = [1, 1, 1]} : vector<7x8x2xf32> to vector<1x8x2xf32>
    %333 = vector.shape_cast %332 : vector<1x8x2xf32> to vector<8x2xf32>
    %334 = tpu.concatenate %331, %333 in 1 : vector<8x2xf32>, vector<8x2xf32> -> vector<8x4xf32>
    %335 = vector.extract_strided_slice %309 {offsets = [1, 0, 0], sizes = [1, 8, 2], strides = [1, 1, 1]} : vector<7x8x2xf32> to vector<1x8x2xf32>
    %336 = vector.shape_cast %335 : vector<1x8x2xf32> to vector<8x2xf32>
    %337 = vector.extract_strided_slice %312 {offsets = [1, 0, 0], sizes = [1, 8, 2], strides = [1, 1, 1]} : vector<7x8x2xf32> to vector<1x8x2xf32>
    %338 = vector.shape_cast %337 : vector<1x8x2xf32> to vector<8x2xf32>
    %339 = tpu.concatenate %336, %338 in 1 : vector<8x2xf32>, vector<8x2xf32> -> vector<8x4xf32>
    %340 = vector.extract_strided_slice %309 {offsets = [2, 0, 0], sizes = [1, 8, 2], strides = [1, 1, 1]} : vector<7x8x2xf32> to vector<1x8x2xf32>
    %341 = vector.shape_cast %340 : vector<1x8x2xf32> to vector<8x2xf32>
    %342 = vector.extract_strided_slice %312 {offsets = [2, 0, 0], sizes = [1, 8, 2], strides = [1, 1, 1]} : vector<7x8x2xf32> to vector<1x8x2xf32>
    %343 = vector.shape_cast %342 : vector<1x8x2xf32> to vector<8x2xf32>
    %344 = tpu.concatenate %341, %343 in 1 : vector<8x2xf32>, vector<8x2xf32> -> vector<8x4xf32>
    %345 = vector.extract_strided_slice %309 {offsets = [3, 0, 0], sizes = [1, 8, 2], strides = [1, 1, 1]} : vector<7x8x2xf32> to vector<1x8x2xf32>
    %346 = vector.shape_cast %345 : vector<1x8x2xf32> to vector<8x2xf32>
    %347 = vector.extract_strided_slice %312 {offsets = [3, 0, 0], sizes = [1, 8, 2], strides = [1, 1, 1]} : vector<7x8x2xf32> to vector<1x8x2xf32>
    %348 = vector.shape_cast %347 : vector<1x8x2xf32> to vector<8x2xf32>
    %349 = tpu.concatenate %346, %348 in 1 : vector<8x2xf32>, vector<8x2xf32> -> vector<8x4xf32>
    %350 = vector.extract_strided_slice %309 {offsets = [4, 0, 0], sizes = [1, 8, 2], strides = [1, 1, 1]} : vector<7x8x2xf32> to vector<1x8x2xf32>
    %351 = vector.shape_cast %350 : vector<1x8x2xf32> to vector<8x2xf32>
    %352 = vector.extract_strided_slice %312 {offsets = [4, 0, 0], sizes = [1, 8, 2], strides = [1, 1, 1]} : vector<7x8x2xf32> to vector<1x8x2xf32>
    %353 = vector.shape_cast %352 : vector<1x8x2xf32> to vector<8x2xf32>
    %354 = tpu.concatenate %351, %353 in 1 : vector<8x2xf32>, vector<8x2xf32> -> vector<8x4xf32>
    %355 = vector.extract_strided_slice %309 {offsets = [5, 0, 0], sizes = [1, 8, 2], strides = [1, 1, 1]} : vector<7x8x2xf32> to vector<1x8x2xf32>
    %356 = vector.shape_cast %355 : vector<1x8x2xf32> to vector<8x2xf32>
    %357 = vector.extract_strided_slice %312 {offsets = [5, 0, 0], sizes = [1, 8, 2], strides = [1, 1, 1]} : vector<7x8x2xf32> to vector<1x8x2xf32>
    %358 = vector.shape_cast %357 : vector<1x8x2xf32> to vector<8x2xf32>
    %359 = tpu.concatenate %356, %358 in 1 : vector<8x2xf32>, vector<8x2xf32> -> vector<8x4xf32>
    %360 = vector.extract_strided_slice %309 {offsets = [6, 0, 0], sizes = [1, 8, 2], strides = [1, 1, 1]} : vector<7x8x2xf32> to vector<1x8x2xf32>
    %361 = vector.shape_cast %360 : vector<1x8x2xf32> to vector<8x2xf32>
    %362 = vector.extract_strided_slice %312 {offsets = [6, 0, 0], sizes = [1, 8, 2], strides = [1, 1, 1]} : vector<7x8x2xf32> to vector<1x8x2xf32>
    %363 = vector.shape_cast %362 : vector<1x8x2xf32> to vector<8x2xf32>
    %364 = tpu.concatenate %361, %363 in 1 : vector<8x2xf32>, vector<8x2xf32> -> vector<8x4xf32>
    %365 = tpu.concatenate %334, %339, %344, %349, %354, %359, %364 in 1 : vector<8x4xf32>, vector<8x4xf32>, vector<8x4xf32>, vector<8x4xf32>, vector<8x4xf32>, vector<8x4xf32>, vector<8x4xf32> -> vector<8x28xf32>
    %c0_55 = arith.constant 0 : index
    %c0_56 = arith.constant 0 : index
    %366 = vector.load %arg9[%c0_55, %c0_56] : memref<16x4xf32, #tpu.memory_space<vmem>>, vector<16x4xf32>
    %cst_57 = arith.constant dense<0.000000e+00> : vector<8x4xf32>
    %367 = tpu.matmul %329, %366, %cst_57 {dimension_numbers = #tpu.dot_dimension_numbers<[1], [0], [0], [1], [0, 0, 1, 1], [], []>} : vector<8x16xf32>, vector<16x4xf32>, vector<8x4xf32> -> vector<8x4xf32>
    %c0_58 = arith.constant 0 : index
    %c0_59 = arith.constant 0 : index
    %368 = vector.load %arg10[%c0_58, %c0_59] : memref<1x4xf32, #tpu.memory_space<vmem>>, vector<1x4xf32>
    %369 = vector.broadcast %368 : vector<1x4xf32> to vector<8x4xf32>
    %370 = arith.addf %367, %369 : vector<8x4xf32>
    %cst_60 = arith.constant 0.000000e+00 : f32
    %371 = vector.broadcast %cst_60 : f32 to vector<8x4xf32>
    %372 = arith.maximumf %370, %371 : vector<8x4xf32>
    %c0_61 = arith.constant 0 : index
    %c0_62 = arith.constant 0 : index
    %373 = vector.load %arg11[%c0_61, %c0_62] : memref<28x16xf32, #tpu.memory_space<vmem>>, vector<28x16xf32>
    %cst_63 = arith.constant dense<0.000000e+00> : vector<8x16xf32>
    %374 = tpu.matmul %365, %373, %cst_63 {dimension_numbers = #tpu.dot_dimension_numbers<[1], [0], [0], [1], [0, 0, 1, 1], [], []>} : vector<8x28xf32>, vector<28x16xf32>, vector<8x16xf32> -> vector<8x16xf32>
    %c0_64 = arith.constant 0 : index
    %c0_65 = arith.constant 0 : index
    %375 = vector.load %arg12[%c0_64, %c0_65] : memref<1x16xf32, #tpu.memory_space<vmem>>, vector<1x16xf32>
    %376 = vector.broadcast %375 : vector<1x16xf32> to vector<8x16xf32>
    %377 = arith.addf %374, %376 : vector<8x16xf32>
    %cst_66 = arith.constant 0.000000e+00 : f32
    %378 = vector.broadcast %cst_66 : f32 to vector<8x16xf32>
    %379 = arith.maximumf %377, %378 : vector<8x16xf32>
    %c0_67 = arith.constant 0 : index
    %c0_68 = arith.constant 0 : index
    %380 = vector.load %arg13[%c0_67, %c0_68] : memref<16x16xf32, #tpu.memory_space<vmem>>, vector<16x16xf32>
    %cst_69 = arith.constant dense<0.000000e+00> : vector<8x16xf32>
    %381 = tpu.matmul %379, %380, %cst_69 {dimension_numbers = #tpu.dot_dimension_numbers<[1], [0], [0], [1], [0, 0, 1, 1], [], []>} : vector<8x16xf32>, vector<16x16xf32>, vector<8x16xf32> -> vector<8x16xf32>
    %c0_70 = arith.constant 0 : index
    %c0_71 = arith.constant 0 : index
    %382 = vector.load %arg14[%c0_70, %c0_71] : memref<4x16xf32, #tpu.memory_space<vmem>>, vector<4x16xf32>
    %cst_72 = arith.constant dense<0.000000e+00> : vector<8x16xf32>
    %383 = tpu.matmul %372, %382, %cst_72 {dimension_numbers = #tpu.dot_dimension_numbers<[1], [0], [0], [1], [0, 0, 1, 1], [], []>} : vector<8x4xf32>, vector<4x16xf32>, vector<8x16xf32> -> vector<8x16xf32>
    %384 = arith.addf %381, %383 : vector<8x16xf32>
    %c0_73 = arith.constant 0 : index
    %c0_74 = arith.constant 0 : index
    %385 = vector.load %arg15[%c0_73, %c0_74] : memref<1x16xf32, #tpu.memory_space<vmem>>, vector<1x16xf32>
    %386 = vector.broadcast %385 : vector<1x16xf32> to vector<8x16xf32>
    %387 = arith.addf %384, %386 : vector<8x16xf32>
    %cst_75 = arith.constant 0.000000e+00 : f32
    %388 = vector.broadcast %cst_75 : f32 to vector<8x16xf32>
    %389 = arith.maximumf %387, %388 : vector<8x16xf32>
    %c0_76 = arith.constant 0 : index
    %c0_77 = arith.constant 0 : index
    %390 = vector.load %arg3[%c0_76, %c0_77] : memref<1x8xf32, #tpu.memory_space<vmem>>, vector<1x8xf32>
    %c0_78 = arith.constant 0 : index
    %c0_79 = arith.constant 0 : index
    %391 = vector.load %arg16[%c0_78, %c0_79] : memref<16x16xf32, #tpu.memory_space<vmem>>, vector<16x16xf32>
    %cst_80 = arith.constant dense<0.000000e+00> : vector<8x16xf32>
    %392 = tpu.matmul %300, %391, %cst_80 {dimension_numbers = #tpu.dot_dimension_numbers<[1], [0], [0], [1], [0, 0, 1, 1], [], []>} : vector<8x16xf32>, vector<16x16xf32>, vector<8x16xf32> -> vector<8x16xf32>
    %c0_81 = arith.constant 0 : index
    %c0_82 = arith.constant 0 : index
    %393 = vector.load %arg17[%c0_81, %c0_82] : memref<16x16xf32, #tpu.memory_space<vmem>>, vector<16x16xf32>
    %cst_83 = arith.constant dense<0.000000e+00> : vector<8x16xf32>
    %394 = tpu.matmul %389, %393, %cst_83 {dimension_numbers = #tpu.dot_dimension_numbers<[1], [0], [0], [1], [0, 0, 1, 1], [], []>} : vector<8x16xf32>, vector<16x16xf32>, vector<8x16xf32> -> vector<8x16xf32>
    %395 = arith.addf %392, %394 : vector<8x16xf32>
    %c0_84 = arith.constant 0 : index
    %c0_85 = arith.constant 0 : index
    %396 = vector.load %arg18[%c0_84, %c0_85] : memref<8x16xf32, #tpu.memory_space<vmem>>, vector<8x16xf32>
    %cst_86 = arith.constant dense<0.000000e+00> : vector<1x16xf32>
    %397 = tpu.matmul %390, %396, %cst_86 {dimension_numbers = #tpu.dot_dimension_numbers<[1], [0], [0], [1], [0, 0, 1, 1], [], []>} : vector<1x8xf32>, vector<8x16xf32>, vector<1x16xf32> -> vector<1x16xf32>
    %398 = vector.broadcast %397 : vector<1x16xf32> to vector<8x16xf32>
    %399 = arith.addf %395, %398 : vector<8x16xf32>
    %c0_87 = arith.constant 0 : index
    %c0_88 = arith.constant 0 : index
    %400 = vector.load %arg19[%c0_87, %c0_88] : memref<1x16xf32, #tpu.memory_space<vmem>>, vector<1x16xf32>
    %401 = vector.broadcast %400 : vector<1x16xf32> to vector<8x16xf32>
    %402 = arith.addf %399, %401 : vector<8x16xf32>
    %cst_89 = arith.constant 0.000000e+00 : f32
    %403 = vector.broadcast %cst_89 : f32 to vector<8x16xf32>
    %404 = arith.maximumf %402, %403 : vector<8x16xf32>
    %405 = vector.extract_strided_slice %6 {offsets = [8, 0, 0], sizes = [1, 8, 2], strides = [1, 1, 1]} : vector<9x8x2xf32> to vector<1x8x2xf32>
    %406 = vector.shape_cast %405 : vector<1x8x2xf32> to vector<8x2xf32>
    %407 = vector.extract_strided_slice %7 {offsets = [8, 0, 0], sizes = [1, 8, 2], strides = [1, 1, 1]} : vector<9x8x2xf32> to vector<1x8x2xf32>
    %408 = vector.shape_cast %407 : vector<1x8x2xf32> to vector<8x2xf32>
    %409 = tpu.concatenate %406, %408 in 1 : vector<8x2xf32>, vector<8x2xf32> -> vector<8x4xf32>
    %410 = vector.extract_strided_slice %12 {offsets = [8, 0, 0], sizes = [1, 8, 2], strides = [1, 1, 1]} : vector<9x8x2xf32> to vector<1x8x2xf32>
    %411 = vector.shape_cast %410 : vector<1x8x2xf32> to vector<8x2xf32>
    %412 = vector.extract_strided_slice %22 {offsets = [8, 0, 0], sizes = [1, 8, 2], strides = [1, 1, 1]} : vector<9x8x2xf32> to vector<1x8x2xf32>
    %413 = vector.shape_cast %412 : vector<1x8x2xf32> to vector<8x2xf32>
    %414 = tpu.concatenate %411, %413 in 1 : vector<8x2xf32>, vector<8x2xf32> -> vector<8x4xf32>
    %c0_90 = arith.constant 0 : index
    %c0_91 = arith.constant 0 : index
    %415 = vector.load %arg20[%c0_90, %c0_91] : memref<4x16xf32, #tpu.memory_space<vmem>>, vector<4x16xf32>
    %cst_92 = arith.constant dense<0.000000e+00> : vector<8x16xf32>
    %416 = tpu.matmul %414, %415, %cst_92 {dimension_numbers = #tpu.dot_dimension_numbers<[1], [0], [0], [1], [0, 0, 1, 1], [], []>} : vector<8x4xf32>, vector<4x16xf32>, vector<8x16xf32> -> vector<8x16xf32>
    %c0_93 = arith.constant 0 : index
    %c0_94 = arith.constant 0 : index
    %417 = vector.load %arg21[%c0_93, %c0_94] : memref<1x16xf32, #tpu.memory_space<vmem>>, vector<1x16xf32>
    %418 = vector.broadcast %417 : vector<1x16xf32> to vector<8x16xf32>
    %419 = arith.addf %416, %418 : vector<8x16xf32>
    %cst_95 = arith.constant 0.000000e+00 : f32
    %420 = vector.broadcast %cst_95 : f32 to vector<8x16xf32>
    %421 = arith.maximumf %419, %420 : vector<8x16xf32>
    %c0_96 = arith.constant 0 : index
    %c0_97 = arith.constant 0 : index
    %422 = vector.load %arg22[%c0_96, %c0_97] : memref<16x64xf32, #tpu.memory_space<vmem>>, vector<16x64xf32>
    %cst_98 = arith.constant dense<0.000000e+00> : vector<8x64xf32>
    %423 = tpu.matmul %421, %422, %cst_98 {dimension_numbers = #tpu.dot_dimension_numbers<[1], [0], [0], [1], [0, 0, 1, 1], [], []>} : vector<8x16xf32>, vector<16x64xf32>, vector<8x64xf32> -> vector<8x64xf32>
    %c0_99 = arith.constant 0 : index
    %c0_100 = arith.constant 0 : index
    %424 = vector.load %arg23[%c0_99, %c0_100] : memref<16x64xf32, #tpu.memory_space<vmem>>, vector<16x64xf32>
    %cst_101 = arith.constant dense<0.000000e+00> : vector<8x64xf32>
    %425 = tpu.matmul %404, %424, %cst_101 {dimension_numbers = #tpu.dot_dimension_numbers<[1], [0], [0], [1], [0, 0, 1, 1], [], []>} : vector<8x16xf32>, vector<16x64xf32>, vector<8x64xf32> -> vector<8x64xf32>
    %426 = arith.addf %423, %425 : vector<8x64xf32>
    %c0_102 = arith.constant 0 : index
    %c0_103 = arith.constant 0 : index
    %427 = vector.load %arg24[%c0_102, %c0_103] : memref<1x64xf32, #tpu.memory_space<vmem>>, vector<1x64xf32>
    %428 = vector.broadcast %427 : vector<1x64xf32> to vector<8x64xf32>
    %429 = arith.addf %426, %428 : vector<8x64xf32>
    %430 = vector.extract_strided_slice %429 {offsets = [0, 0], sizes = [8, 16], strides = [1, 1]} : vector<8x64xf32> to vector<8x16xf32>
    %431 = arith.negf %430 : vector<8x16xf32>
    %432 = math.exp %431 : vector<8x16xf32>
    %cst_104 = arith.constant 1.000000e+00 : f32
    %433 = vector.broadcast %cst_104 : f32 to vector<8x16xf32>
    %434 = arith.addf %433, %432 : vector<8x16xf32>
    %435 = arith.divf %433, %434 : vector<8x16xf32>
    %436 = vector.extract_strided_slice %429 {offsets = [0, 32], sizes = [8, 16], strides = [1, 1]} : vector<8x64xf32> to vector<8x16xf32>
    %437 = math.tanh %436 : vector<8x16xf32>
    %438 = vector.extract_strided_slice %429 {offsets = [0, 48], sizes = [8, 16], strides = [1, 1]} : vector<8x64xf32> to vector<8x16xf32>
    %439 = arith.negf %438 : vector<8x16xf32>
    %440 = math.exp %439 : vector<8x16xf32>
    %cst_105 = arith.constant 1.000000e+00 : f32
    %441 = vector.broadcast %cst_105 : f32 to vector<8x16xf32>
    %442 = arith.addf %441, %440 : vector<8x16xf32>
    %443 = arith.divf %441, %442 : vector<8x16xf32>
    %444 = arith.mulf %435, %437 : vector<8x16xf32>
    %445 = math.tanh %444 : vector<8x16xf32>
    %446 = arith.mulf %443, %445 : vector<8x16xf32>
    %c0_106 = arith.constant 0 : index
    %c0_107 = arith.constant 0 : index
    %447 = vector.load %arg25[%c0_106, %c0_107] : memref<16x4xf32, #tpu.memory_space<vmem>>, vector<16x4xf32>
    %cst_108 = arith.constant dense<0.000000e+00> : vector<8x4xf32>
    %448 = tpu.matmul %446, %447, %cst_108 {dimension_numbers = #tpu.dot_dimension_numbers<[1], [0], [0], [1], [0, 0, 1, 1], [], []>} : vector<8x16xf32>, vector<16x4xf32>, vector<8x4xf32> -> vector<8x4xf32>
    %c0_109 = arith.constant 0 : index
    %c0_110 = arith.constant 0 : index
    %449 = vector.load %arg26[%c0_109, %c0_110] : memref<1x4xf32, #tpu.memory_space<vmem>>, vector<1x4xf32>
    %450 = vector.broadcast %449 : vector<1x4xf32> to vector<8x4xf32>
    %451 = arith.addf %448, %450 : vector<8x4xf32>
    %452 = vector.extract_strided_slice %409 {offsets = [0, 0], sizes = [8, 2], strides = [1, 1]} : vector<8x4xf32> to vector<8x2xf32>
    %453 = vector.extract_strided_slice %451 {offsets = [0, 0], sizes = [8, 2], strides = [1, 1]} : vector<8x4xf32> to vector<8x2xf32>
    %454 = arith.addf %452, %453 : vector<8x2xf32>
    %455 = vector.extract_strided_slice %409 {offsets = [0, 2], sizes = [8, 2], strides = [1, 1]} : vector<8x4xf32> to vector<8x2xf32>
    %456 = vector.extract_strided_slice %451 {offsets = [0, 2], sizes = [8, 2], strides = [1, 1]} : vector<8x4xf32> to vector<8x2xf32>
    %457 = math.exp %456 : vector<8x2xf32>
    %458 = arith.mulf %455, %457 : vector<8x2xf32>
    %459 = tpu.concatenate %454, %458 in 1 : vector<8x2xf32>, vector<8x2xf32> -> vector<8x4xf32>
    %c0_111 = arith.constant 0 : index
    %c0_112 = arith.constant 0 : index
    %460 = vector.load %arg28[%c0_111, %c0_112] : memref<8x4xf32, #tpu.memory_space<vmem>>, vector<8x4xf32>
    tpu.vector_store %arg28[%c0_111, %c0_112], %451 {strides = array<i32>} : memref<8x4xf32, #tpu.memory_space<vmem>>, vector<8x4xf32>,
    %c0_113 = arith.constant 0 : index
    %c0_114 = arith.constant 0 : index
    %461 = vector.load %arg27[%c0_113, %c0_114] : memref<8x4xf32, #tpu.memory_space<vmem>>, vector<8x4xf32>
    tpu.vector_store %arg27[%c0_113, %c0_114], %459 {strides = array<i32>} : memref<8x4xf32, #tpu.memory_space<vmem>>, vector<8x4xf32>,
    return
  }
  func.func @transform_0(%arg0: i32) -> (i32, i32, i32) {
    %c0_i32 = arith.constant 0 : i32
    %c0_i32_0 = arith.constant 0 : i32
    %c0_i32_1 = arith.constant 0 : i32
    return %c0_i32, %arg0, %c0_i32_0 : i32, i32, i32
  }
  func.func @transform_1(%arg0: i32) -> (i32, i32, i32) {
    %c0_i32 = arith.constant 0 : i32
    %c0_i32_0 = arith.constant 0 : i32
    %c0_i32_1 = arith.constant 0 : i32
    return %c0_i32, %arg0, %c0_i32_0 : i32, i32, i32
  }
  func.func @transform_2(%arg0: i32) -> (i32, i32) {
    %c0_i32 = arith.constant 0 : i32
    %c0_i32_0 = arith.constant 0 : i32
    %c0_i32_1 = arith.constant 0 : i32
    return %c0_i32, %c0_i32_0 : i32, i32
  }
  func.func @transform_3(%arg0: i32) -> (i32, i32) {
    %c0_i32 = arith.constant 0 : i32
    %c0_i32_0 = arith.constant 0 : i32
    %c0_i32_1 = arith.constant 0 : i32
    return %c0_i32, %c0_i32_0 : i32, i32
  }
  func.func @transform_4(%arg0: i32) -> (i32, i32) {
    %c0_i32 = arith.constant 0 : i32
    %c0_i32_0 = arith.constant 0 : i32
    %c0_i32_1 = arith.constant 0 : i32
    return %c0_i32, %c0_i32_0 : i32, i32
  }
  func.func @transform_5(%arg0: i32) -> (i32, i32) {
    %c0_i32 = arith.constant 0 : i32
    %c0_i32_0 = arith.constant 0 : i32
    %c0_i32_1 = arith.constant 0 : i32
    return %c0_i32, %c0_i32_0 : i32, i32
  }
  func.func @transform_6(%arg0: i32) -> (i32, i32) {
    %c0_i32 = arith.constant 0 : i32
    %c0_i32_0 = arith.constant 0 : i32
    %c0_i32_1 = arith.constant 0 : i32
    return %c0_i32, %c0_i32_0 : i32, i32
  }
  func.func @transform_7(%arg0: i32) -> (i32, i32) {
    %c0_i32 = arith.constant 0 : i32
    %c0_i32_0 = arith.constant 0 : i32
    %c0_i32_1 = arith.constant 0 : i32
    return %c0_i32, %c0_i32_0 : i32, i32
  }
  func.func @transform_8(%arg0: i32) -> (i32, i32) {
    %c0_i32 = arith.constant 0 : i32
    %c0_i32_0 = arith.constant 0 : i32
    %c0_i32_1 = arith.constant 0 : i32
    return %c0_i32, %c0_i32_0 : i32, i32
  }
  func.func @transform_9(%arg0: i32) -> (i32, i32) {
    %c0_i32 = arith.constant 0 : i32
    %c0_i32_0 = arith.constant 0 : i32
    %c0_i32_1 = arith.constant 0 : i32
    return %c0_i32, %c0_i32_0 : i32, i32
  }
  func.func @transform_10(%arg0: i32) -> (i32, i32) {
    %c0_i32 = arith.constant 0 : i32
    %c0_i32_0 = arith.constant 0 : i32
    %c0_i32_1 = arith.constant 0 : i32
    return %c0_i32, %c0_i32_0 : i32, i32
  }
  func.func @transform_11(%arg0: i32) -> (i32, i32) {
    %c0_i32 = arith.constant 0 : i32
    %c0_i32_0 = arith.constant 0 : i32
    %c0_i32_1 = arith.constant 0 : i32
    return %c0_i32, %c0_i32_0 : i32, i32
  }
  func.func @transform_12(%arg0: i32) -> (i32, i32) {
    %c0_i32 = arith.constant 0 : i32
    %c0_i32_0 = arith.constant 0 : i32
    %c0_i32_1 = arith.constant 0 : i32
    return %c0_i32, %c0_i32_0 : i32, i32
  }
  func.func @transform_13(%arg0: i32) -> (i32, i32) {
    %c0_i32 = arith.constant 0 : i32
    %c0_i32_0 = arith.constant 0 : i32
    %c0_i32_1 = arith.constant 0 : i32
    return %c0_i32, %c0_i32_0 : i32, i32
  }
  func.func @transform_14(%arg0: i32) -> (i32, i32) {
    %c0_i32 = arith.constant 0 : i32
    %c0_i32_0 = arith.constant 0 : i32
    %c0_i32_1 = arith.constant 0 : i32
    return %c0_i32, %c0_i32_0 : i32, i32
  }
  func.func @transform_15(%arg0: i32) -> (i32, i32) {
    %c0_i32 = arith.constant 0 : i32
    %c0_i32_0 = arith.constant 0 : i32
    %c0_i32_1 = arith.constant 0 : i32
    return %c0_i32, %c0_i32_0 : i32, i32
  }
  func.func @transform_16(%arg0: i32) -> (i32, i32) {
    %c0_i32 = arith.constant 0 : i32
    %c0_i32_0 = arith.constant 0 : i32
    %c0_i32_1 = arith.constant 0 : i32
    return %c0_i32, %c0_i32_0 : i32, i32
  }
  func.func @transform_17(%arg0: i32) -> (i32, i32) {
    %c0_i32 = arith.constant 0 : i32
    %c0_i32_0 = arith.constant 0 : i32
    %c0_i32_1 = arith.constant 0 : i32
    return %c0_i32, %c0_i32_0 : i32, i32
  }
  func.func @transform_18(%arg0: i32) -> (i32, i32) {
    %c0_i32 = arith.constant 0 : i32
    %c0_i32_0 = arith.constant 0 : i32
    %c0_i32_1 = arith.constant 0 : i32
    return %c0_i32, %c0_i32_0 : i32, i32
  }
  func.func @transform_19(%arg0: i32) -> (i32, i32) {
    %c0_i32 = arith.constant 0 : i32
    %c0_i32_0 = arith.constant 0 : i32
    %c0_i32_1 = arith.constant 0 : i32
    return %c0_i32, %c0_i32_0 : i32, i32
  }
  func.func @transform_20(%arg0: i32) -> (i32, i32) {
    %c0_i32 = arith.constant 0 : i32
    %c0_i32_0 = arith.constant 0 : i32
    %c0_i32_1 = arith.constant 0 : i32
    return %c0_i32, %c0_i32_0 : i32, i32
  }
  func.func @transform_21(%arg0: i32) -> (i32, i32) {
    %c0_i32 = arith.constant 0 : i32
    %c0_i32_0 = arith.constant 0 : i32
    %c0_i32_1 = arith.constant 0 : i32
    return %c0_i32, %c0_i32_0 : i32, i32
  }
  func.func @transform_22(%arg0: i32) -> (i32, i32) {
    %c0_i32 = arith.constant 0 : i32
    %c0_i32_0 = arith.constant 0 : i32
    %c0_i32_1 = arith.constant 0 : i32
    return %c0_i32, %c0_i32_0 : i32, i32
  }
  func.func @transform_23(%arg0: i32) -> (i32, i32) {
    %c0_i32 = arith.constant 0 : i32
    %c0_i32_0 = arith.constant 0 : i32
    %c0_i32_1 = arith.constant 0 : i32
    return %c0_i32, %c0_i32_0 : i32, i32
  }
  func.func @transform_24(%arg0: i32) -> (i32, i32) {
    %c0_i32 = arith.constant 0 : i32
    %c0_i32_0 = arith.constant 0 : i32
    %c0_i32_1 = arith.constant 0 : i32
    return %c0_i32, %c0_i32_0 : i32, i32
  }
  func.func @transform_25(%arg0: i32) -> (i32, i32) {
    %c0_i32 = arith.constant 0 : i32
    %c0_i32_0 = arith.constant 0 : i32
    %c0_i32_1 = arith.constant 0 : i32
    return %c0_i32, %c0_i32_0 : i32, i32
  }
  func.func @transform_26(%arg0: i32) -> (i32, i32) {
    %c0_i32 = arith.constant 0 : i32
    %c0_i32_0 = arith.constant 0 : i32
    return %arg0, %c0_i32 : i32, i32
  }
  func.func @transform_27(%arg0: i32) -> (i32, i32) {
    %c0_i32 = arith.constant 0 : i32
    %c0_i32_0 = arith.constant 0 : i32
    return %arg0, %c0_i32 : i32, i32
  }
}

</mosaic_0001>

<bundles_post_ra>
// kernel: tpu_custom_call.1
= control target key start
LH: loop header
LB: loop body
LE: loop exit
PB: predicated region body
PF: predicated region fallthrough
CT: control target
= control target key end

     0   :  { %vm388_vm8 = vcmask 1043456   ;;  %v1896_v40 = vmov 0.0   ;;  %vm328_vm9 = vcmask 15360   ;;  %vm363_vm10 = vcmask 31744   ;;  %s1898_s30 = smov 16   ;;  %s1900_s29 = smov 80   ;;  %s2639_s0 = inlined_call_operand.vmem [shape: f32[9,8,4], index: 0, kind: input, shape index: {}]   ;;  %s2640_s1 = inlined_call_operand.vmem [shape: f32[9,8,4], index: 1, kind: input, shape index: {}]   ;;  %s2641_s4 = inlined_call_operand.vmem [shape: f32[1,16], index: 4, kind: input, shape index: {}]   ;;  %s2642_s3 = inlined_call_operand.vmem [shape: f32[4,16], index: 3, kind: input, shape index: {}]   ;;  %s2643_s6 = inlined_call_operand.vmem [shape: f32[16,64], index: 6, kind: input, shape index: {}]   ;;  %s2644_s7 = inlined_call_operand.vmem [shape: f32[1,64], index: 7, kind: input, shape index: {}]   ;;  %s2645_s5 = inlined_call_operand.vmem [shape: f32[16,64], index: 5, kind: input, shape index: {}]   ;;  %s2646_s10 = inlined_call_operand.vmem [shape: f32[28,16], index: 10, kind: input, shape index: {}]   ;;  %s2647_s8 = inlined_call_operand.vmem [shape: f32[16,4], index: 8, kind: input, shape index: {}]   ;;  %s2648_s11 = inlined_call_operand.vmem [shape: f32[1,16], index: 11, kind: input, shape index: {}]   ;;  %s2649_s9 = inlined_call_operand.vmem [shape: f32[1,4], index: 9, kind: input, shape index: {}]   ;;  %s2650_s12 = inlined_call_operand.vmem [shape: f32[16,16], index: 12, kind: input, shape index: {}]   ;;  %s2651_s13 = inlined_call_operand.vmem [shape: f32[4,16], index: 13, kind: input, shape index: {}]   ;;  %s2652_s14 = inlined_call_operand.vmem [shape: f32[1,16], index: 14, kind: input, shape index: {}]   ;;  %s2653_s16 = inlined_call_operand.vmem [shape: f32[16,16], index: 16, kind: input, shape index: {}]   ;;  %s2654_s15 = inlined_call_operand.vmem [shape: f32[16,16], index: 15, kind: input, shape index: {}]   ;;  %s2655_s17 = inlined_call_operand.vmem [shape: f32[8,16], index: 17, kind: input, shape index: {}]   ;;  %s2656_s2 = inlined_call_operand.vmem [shape: f32[1,8], index: 2, kind: input, shape index: {}]   ;;  %s2657_s19 = inlined_call_operand.vmem [shape: f32[4,16], index: 19, kind: input, shape index: {}]   ;;  %s2658_s22 = inlined_call_operand.vmem [shape: f32[16,64], index: 22, kind: input, shape index: {}]   ;;  %s2659_s21 = inlined_call_operand.vmem [shape: f32[16,64], index: 21, kind: input, shape index: {}]   ;;  %s2660_s18 = inlined_call_operand.vmem [shape: f32[1,16], index: 18, kind: input, shape index: {}]   ;;  %s2661_s20 = inlined_call_operand.vmem [shape: f32[1,16], index: 20, kind: input, shape index: {}]   ;;  %s2662_s23 = inlined_call_operand.vmem [shape: f32[1,64], index: 23, kind: input, shape index: {}]   ;;  %s2663_s25 = inlined_call_operand.vmem [shape: f32[1,4], index: 25, kind: input, shape index: {}]   ;;  %s2664_s24 = inlined_call_operand.vmem [shape: f32[16,4], index: 24, kind: input, shape index: {}]   ;;  %s2665_s27 = inlined_call_operand.vmem [shape: f32[8,4], index: 27, kind: output, shape index: {1}]   ;;  %s2666_s26 = inlined_call_operand.vmem [shape: f32[8,4], index: 26, kind: output, shape index: {0}]  }
   0x1   :  { %2674 = sst [smem:[#allocation2_spill]] %s2639_s0  ;;  %vm439_vm11 = vcmask 130048   ;;  %s1899_s0 = smov 32  }
   0x2   :  { %2675 = sst [smem:[#allocation3_spill]] %s2641_s4 }
   0x3   :  { %2676 = sst [smem:[#allocation4_spill]] %s2642_s3 }
   0x4   :  { %2677 = sst [smem:[#allocation5_spill]] %s2643_s6  ;;  %s1897_s6 = smov 96  }
   0x5   :  { %2678 = sst [smem:[#allocation6_spill]] %s2644_s7  ;;  %s1894_s7 = smov 126  }
   0x6   :  { %2679 = sst [smem:[#allocation7_spill]] %s2645_s5 }
   0x7   :  { %2680 = sst [smem:[#allocation8_spill]] %s2646_s10 }
   0x8   :  { %2681 = sst [smem:[#allocation9_spill]] %s2647_s8 }
   0x9   :  { %2682 = sst [smem:[#allocation10_spill]] %s2648_s11  ;;  %s1904_s11 = smov 12  }
   0xa   :  { %2683 = sst [smem:[#allocation11_spill]] %s2649_s9  ;;  %s1895_s9 = smov 2  }
   0xb   :  { %2684 = sst [smem:[#allocation12_spill]] %s2650_s12 }
   0xc   :  { %s2685_s8 = sld [smem:[#allocation2_spill]] }
   0xd   :  { %s2686_s5 = sld [smem:[#allocation4_spill]] }
   0xe   :  { %s2687_s4 = sld [smem:[#allocation5_spill]] }
   0xf   :  { %s2688_s28 = sld [smem:[#allocation7_spill]] }
  0x10   :  { %s2689_s12 = sld [smem:[#allocation3_spill]] }
  0x11   :  { %s2690_s10 = sld [smem:[#allocation6_spill]] }
  0x12   :  { %v2052_v0 = vld [vmem:[%s2685_s8] sm:$0xff]  ;;  %v2057_v1 = vld [vmem:[%s2685_s8 + $0x8] sm:$0xff]  ;;  %v2066_v16 = vld [vmem:[%s2685_s8 + $0x10] sm:$0xff] }
  0x13   :  { %v164_v2 = vadd.f32 1e-06, %v2052_v0  ;;  %v156_v3 = vadd.f32 1e-06, %v2057_v1  ;;  %v95_v4 = vmul.f32 0.5, %v2057_v1  ;;  %v94_v33 = vmul.f32 0.5, %v2052_v0 }
  0x14   :  { %v2069_v21 = vadd.f32 1e-06, %v2066_v16  ;;  %v96_v34 = vmul.f32 0.5, %v2066_v16  ;;  %v358_v37 = vld [vmem:[%s2686_s5] sm:$0xf]  ;;  %v2087_v38 = vld [vmem:[%s2687_s4 + $0x8] sm:$0xff] }
  0x15   :  { %1765 = vrcp.f32 %v164_v2  ;;  %114 = vrot.lane.b32.xlu1 %v95_v4, %s1894_s7  ;;  %vm170_vm0 = vweird.f32 %v164_v2  ;;  %v176_v8 = vand.u32 2147483648, %v164_v2  ;;  %v174_v11 = vand.u32 2147483647, %v164_v2  ;;  %1694 = vmatpush.msk.msra.mxu0 %vm388_vm8, %v358_v37  ;;  %v2092_v39 = vld [vmem:[%s2687_s4] sm:$0xff]  ;;  %v434_v53 = vld [vmem:[%s2688_s28 + $0x8] sm:$0xff]  ;;  %s1903_s4 = smov 4  }
  0x16   :  { %1767 = vrcp.f32 %v156_v3  ;;  %v191_v12 = vand.u32 2147483648, %v156_v3  ;;  %vm185_vm2 = vweird.f32 %v156_v3  ;;  %v189_v14 = vand.u32 2147483647, %v156_v3  ;;  %524 = vmatpush.msra.mxu2 %v2087_v38  ;;  %587 = vmatpush.msra.mxu3 %v2087_v38  ;;  %v433_v54 = vld [vmem:[%s2688_s28] sm:$0xff]  ;;  %s1905_s5 = smov 6   ;;  %s2692_s28 = sld [smem:[#allocation9_spill]] }
  0x17   :  { %v177_v17 = vor.u32 1.1754944e-38, %v176_v8  ;;  %vm175_vm5 = vcmp.eq.f32.partialorder %v174_v11, 8.507059e+37  ;;  %478 = vmatpush.msra.mxu1 %v434_v53  ;;  %v2136_v55 = vld [vmem:[%s2689_s12] ss:$0 sm:$0xff]  ;;  %s2693_s12 = sld [smem:[#allocation12_spill]] }
  0x18   :  { %v192_v20 = vor.u32 1.1754944e-38, %v191_v12  ;;  %vm190_vm7 = vcmp.eq.f32.partialorder %v189_v14, 8.507059e+37  ;;  %525 = vmatpush.msra.mxu2 %v2092_v39  ;;  %588 = vmatpush.msra.mxu3 %v2092_v39  ;;  %v2145_v60 = vld [vmem:[%s2690_s10] ss:$0 sm:$0xff] }
  0x19   :  { %526 = vmatmul.f32.vlgmr.msra.gmra.mxu2 %v1896_v40  ;;  %479 = vmatpush.msra.mxu1 %v433_v54 }
  0x1a   :  { %713 = vmatpush.msrb.mxu3 %v2087_v38  ;;  %650 = vmatpush.msrb.mxu2 %v2087_v38 }
  0x1b   :  { %v1766_v5 = vpop.eup %1765 }
  0x1c   :  { %v1768_v6 = vpop.eup %1767  ;;  %v166_v7 = vmul.f32 %v1766_v5, %v164_v2  ;;  %vm171_vm1 = vweird.f32 %v1766_v5  ;;  %714 = vmatpush.msrb.mxu3 %v2092_v39  ;;  %651 = vmatpush.msrb.mxu2 %v2092_v39 }
  0x1d   :  { %v181_v9 = vmul.f32 %v1768_v6, %v156_v3  ;;  %vm186_vm3 = vweird.f32 %v1768_v6  ;;  %vm172_vm4 = vmor %vm170_vm0, %vm171_vm1  ;;  %vm200_vm0 = vweird.f32 %v2069_v21 }
  0x1e   :  { %v167_v10 = vsub.f32 1.0, %v166_v7  ;;  %vm187_vm6 = vmor %vm185_vm2, %vm186_vm3  ;;  %776 = vmatpush.msra.mxu2 %v2087_v38 }
  0x1f   :  { %v182_v13 = vsub.f32 1.0, %v181_v9 }
  0x20   :  { %v168_v15 = vmul.f32 %v1766_v5, %v167_v10  ;;  %777 = vmatpush.msra.mxu2 %v2092_v39 }
  0x21   :  { %v183_v18 = vmul.f32 %v1768_v6, %v182_v13 }
  0x22   :  { %v169_v19 = vadd.f32 %v1766_v5, %v168_v15 }
  0x23   :  { %v184_v22 = vadd.f32 %v1768_v6, %v183_v18 }
  0x24   :  { %v173_v23 = vsel %vm172_vm4, %v1766_v5, %v169_v19  ;;  %v206_v19 = vand.u32 2147483648, %v2069_v21 }
  0x25   :  { %v178_v24 = vsel %vm175_vm5, %v177_v17, %v173_v23  ;;  %v188_v25 = vsel %vm187_vm6, %v1768_v6, %v184_v22  ;;  %v204_v22 = vand.u32 2147483647, %v2069_v21  ;;  %v2158_v23 = vld [vmem:[%s2685_s8 + $0x18] sm:$0xff] }
  0x26   :  { %v179_v26 = vmul.f32 %v178_v24, %v156_v3  ;;  %v193_v27 = vsel %vm190_vm7, %v192_v20, %v188_v25  ;;  %v207_v25 = vor.u32 1.1754944e-38, %v206_v19 }
  0x27   :  { %v194_v28 = vmul.f32 %v193_v27, %v2069_v21  ;;  %vm205_vm3 = vcmp.eq.f32.partialorder %v204_v22, 8.507059e+37 }
  0x28   :  { %1769 = vlog2.f32 %v179_v26  ;;  %v2161_v26 = vadd.f32 1e-06, %v2158_v23 }
  0x29   :  { %1771 = vlog2.f32 %v194_v28 }
  0x2a   :  { %vm215_vm4 = vweird.f32 %v2161_v26 }
  0x2e   :  { %v1770_v29 = vpop.eup %1769 }
  0x2f   :  { %v1772_v30 = vpop.eup %1771  ;;  %v286_v31 = vmul.f32 0.6931472, %v1770_v29 }
  0x30   :  { %v288_v32 = vmul.f32 0.6931472, %v1772_v30 }
  0x31   :  { %309 = vrot.lane.b32.xlu0 %v286_v31, %s1894_s7 }
  0x32   :  { %311 = vrot.lane.b32.xlu2 %v288_v32, %s1894_s7 }
  0x39   :  { %112 = vrot.lane.b32.xlu0 %v94_v33, %s1894_s7 }
  0x41   :  { %116 = vrot.lane.b32.xlu0 %v96_v34, %s1894_s7 }
  0x87   :  { %v115_v42 = vpop.permute.xlu1 %114 }
  0x88   :  { %v2108_v44 = vadd.f32 %v115_v42, %v2057_v1 }
  0x8c   :  { %v312_v36 = vpop.permute.xlu2 %311 }
  0x9c   :  { %v527_v62 = vpop.f32.mrf.mxu2 }
  0xa3   :  { %v310_v35 = vpop.permute.xlu0 %309 }
  0xa4   :  { %325 = vrot.lane.b32.xlu1 %v310_v35, %s1895_s9 }
  0xab   :  { %v113_v41 = vpop.permute.xlu0 %112 }
  0xac   :  { %330 = vrot.lane.b32.xlu1 %v312_v36, %s1895_s9  ;;  %v2105_v43 = vadd.f32 %v113_v41, %v2052_v0  ;;  %v97_v41 = vmul.f32 0.5, %v2158_v23 }
  0xae   :  { %v2112_v45 = vsub.f32 %v2108_v44, %v2105_v43 }
  0xb3   :  { %v117_v46 = vpop.permute.xlu0 %116 }
  0xb4   :  { %v2118_v49 = vadd.f32 %v117_v46, %v2066_v16 }
  0xb6   :  { %v2122_v50 = vsub.f32 %v2118_v49, %v2108_v44 }
 0x116   :  { %v326_v47 = vpop.permute.xlu1 %325 }
 0x117   :  { %v329_v48 = vsel %vm328_vm9, %v2112_v45, %v326_v47 }
 0x118   :  { %1695 = vmatmul.msk.f32.vlgmr.msra.gmra.mxu0 %vm363_vm10, %v329_v48 }
 0x11e   :  { %v331_v51 = vpop.permute.xlu1 %330 }
 0x11f   :  { %v333_v52 = vsel %vm328_vm9, %v2122_v50, %v331_v51 }
 0x120   :  { %1696 = vmatmul.msk.f32.gmra.mxu0 %vm363_vm10, %v333_v52 }
 0x195   :  { %v409_v56 = vpop.f32.mrf.mxu0 }
 0x196   :  { %v410_v57 = vadd.f32 %v2136_v55, %v409_v56 }
 0x198   :  { %1703 = vmatmul.msk.f32.vlgmr.msra.gmra.mxu1 %vm439_vm11, %v410_v57 }
 0x19d   :  { %v412_v58 = vpop.f32.mrf.mxu0 }
 0x19e   :  { %v413_v59 = vadd.f32 %v2136_v55, %v412_v58 }
 0x1a0   :  { %1704 = vmatmul.msk.f32.gmra.mxu1 %vm439_vm11, %v413_v59 }
 0x215   :  { %v481_v61 = vpop.f32.mrf.mxu1 }
 0x216   :  { %v482_v63 = vadd.f32 %v2145_v60, %v481_v61 }
 0x218   :  { %v530_v0 = vadd.f32 %v527_v62, %v482_v63 }
 0x21a   :  { %1773 = vtanh.f32 %v530_v0  ;;  %v1711_v2 = vmul.f32 -1.442695, %v530_v0 }
 0x21c   :  { %1775 = vpow2.f32 %v1711_v2 }
 0x21d   :  { %v484_v53 = vpop.f32.mrf.mxu1 }
 0x21e   :  { %v485_v54 = vadd.f32 %v2145_v60, %v484_v53 }
 0x220   :  { %v1774_v1 = vpop.eup %1773 }
 0x221   :  { %553 = vrot.lane.b32.xlu2 %v1774_v1, %s1897_s6 }
 0x222   :  { %v1776_v3 = vpop.eup %1775 }
 0x223   :  { %v534_v4 = vadd.f32 1.0, %v1776_v3 }
 0x225   :  { %1777 = vrcp.f32 %v534_v4  ;;  %v546_v10 = vand.u32 2147483648, %v534_v4  ;;  %vm540_vm13 = vweird.f32 %v534_v4  ;;  %v544_v11 = vand.u32 2147483647, %v534_v4 }
 0x226   :  { %1779 = vrcp.f32 %v2069_v21 }
 0x227   :  { %v547_v13 = vor.u32 1.1754944e-38, %v546_v10  ;;  %vm545_vm15 = vcmp.eq.f32.partialorder %v544_v11, 8.507059e+37  ;;  %v2198_v11 = vld [vmem:[%s2685_s8 + $0x20] sm:$0xff] }
 0x22b   :  { %v1778_v5 = vpop.eup %1777 }
 0x22c   :  { %v536_v6 = vmul.f32 %v1778_v5, %v534_v4  ;;  %vm541_vm12 = vweird.f32 %v1778_v5  ;;  %v1780_v17 = vpop.eup %1779 }
 0x22d   :  { %vm542_vm14 = vmor %vm540_vm13, %vm541_vm12  ;;  %v196_v18 = vmul.f32 %v1780_v17, %v2069_v21  ;;  %vm201_vm1 = vweird.f32 %v1780_v17 }
 0x22e   :  { %v537_v7 = vsub.f32 1.0, %v536_v6  ;;  %vm202_vm2 = vmor %vm200_vm0, %vm201_vm1  ;;  %v221_v6 = vand.u32 2147483648, %v2161_v26 }
 0x22f   :  { %v197_v20 = vsub.f32 1.0, %v196_v18 }
 0x230   :  { %v538_v8 = vmul.f32 %v1778_v5, %v537_v7 }
 0x231   :  { %v198_v24 = vmul.f32 %v1780_v17, %v197_v20 }
 0x232   :  { %v539_v9 = vadd.f32 %v1778_v5, %v538_v8  ;;  %v219_v8 = vand.u32 2147483647, %v2161_v26 }
 0x233   :  { %v199_v27 = vadd.f32 %v1780_v17, %v198_v24 }
 0x234   :  { %v543_v12 = vsel %vm542_vm14, %v1778_v5, %v539_v9  ;;  %vm220_vm7 = vcmp.eq.f32.partialorder %v219_v8, 8.507059e+37 }
 0x235   :  { %v548_v15 = vsel %vm545_vm15, %v547_v13, %v543_v12  ;;  %v203_v28 = vsel %vm202_vm2, %v1780_v17, %v199_v27  ;;  %v222_v12 = vor.u32 1.1754944e-38, %v221_v6 }
 0x236   :  { %v208_v29 = vsel %vm205_vm3, %v207_v25, %v203_v28  ;;  %v551_v32 = vmul.f32 0.0, %v548_v15 }
 0x237   :  { %v209_v30 = vmul.f32 %v208_v29, %v2161_v26 }
 0x239   :  { %1781 = vlog2.f32 %v209_v30 }
 0x23f   :  { %v1782_v31 = vpop.eup %1781 }
 0x240   :  { %v290_v21 = vmul.f32 0.6931472, %v1782_v31 }
 0x27b   :  { %v554_v14 = vpop.permute.xlu2 %553 }
 0x27c   :  { %v556_v16 = vmul.f32 %v554_v14, %v548_v15 }
 0x27e   :  { %558 = vrot.lane.b32.xlu2 %v556_v16, %s1898_s30 }
 0x286   :  { %313 = vrot.lane.b32.xlu2 %v290_v21, %s1894_s7 }
 0x2d8   :  { %v559_v33 = vpop.permute.xlu2 %558 }
 0x2d9   :  { %v2165_v34 = vadd.f32 %v559_v33, %v551_v32 }
 0x2db   :  { %1783 = vtanh.f32 %v2165_v34 }
 0x2e0   :  { %v314_v36 = vpop.permute.xlu2 %313 }
 0x2e1   :  { %v1784_v35 = vpop.eup %1783  ;;  %334 = vrot.lane.b32.xlu2 %v314_v36, %s1895_s9 }
 0x2e2   :  { %564 = vrot.lane.b32.xlu0 %v1784_v35, %s1899_s0 }
 0x33b   :  { %v335_v48 = vpop.permute.xlu2 %334 }
 0x354   :  { %v565_v37 = vpop.permute.xlu0 %564 }
 0x355   :  { %v567_v40 = vmul.f32 %v565_v37, %v548_v15  ;;  %v2201_v15 = vadd.f32 1e-06, %v2198_v11  ;;  %v98_v37 = vmul.f32 0.5, %v2198_v11 }
 0x357   :  { %569 = vrot.lane.b32.xlu1 %v567_v40, %s1900_s29  ;;  %vm230_vm0 = vweird.f32 %v2201_v15 }
 0x35f   :  { %118 = vrot.lane.b32.xlu1 %v97_v41, %s1894_s7 }
 0x3c9   :  { %v570_v42 = vpop.permute.xlu1 %569 }
 0x3ca   :  { %1712 = vmatmul.msk.f32.vlgmr.msra.gmra.mxu3 %vm439_vm11, %v570_v42 }
 0x3cb   :  { %839 = vmatpush.msra.mxu3 %v2087_v38 }
 0x3cd   :  { %840 = vmatpush.msra.mxu3 %v2092_v39 }
 0x3d1   :  { %v119_v46 = vpop.permute.xlu1 %118 }
 0x3d2   :  { %v2177_v47 = vadd.f32 %v119_v46, %v2158_v23 }
 0x3d4   :  { %v2181_v51 = vsub.f32 %v2177_v47, %v2118_v49 }
 0x3d6   :  { %v337_v52 = vsel %vm328_vm9, %v2181_v51, %v335_v48 }
 0x3d7   :  { %1697 = vmatmul.msk.f32.gmra.mxu0 %vm363_vm10, %v337_v52 }
 0x44d   :  { %v590_v56 = vpop.f32.mrf.mxu3 }
 0x44e   :  { %v593_v57 = vadd.f32 %v590_v56, %v485_v54 }
 0x450   :  { %1785 = vtanh.f32 %v593_v57  ;;  %v1713_v62 = vmul.f32 -1.442695, %v593_v57 }
 0x452   :  { %1787 = vpow2.f32 %v1713_v62 }
 0x453   :  { %1789 = vrcp.f32 %v2161_v26 }
 0x454   :  { %v415_v58 = vpop.f32.mrf.mxu0 }
 0x455   :  { %v416_v59 = vadd.f32 %v2136_v55, %v415_v58 }
 0x456   :  { %v1786_v61 = vpop.eup %1785 }
 0x457   :  { %616 = vrot.lane.b32.xlu0 %v1786_v61, %s1897_s6  ;;  %1705 = vmatmul.msk.f32.gmra.mxu1 %vm439_vm11, %v416_v59 }
 0x458   :  { %v1788_v63 = vpop.eup %1787 }
 0x459   :  { %v597_v0 = vadd.f32 1.0, %v1788_v63  ;;  %v1790_v1 = vpop.eup %1789 }
 0x45a   :  { %v211_v3 = vmul.f32 %v1790_v1, %v2161_v26  ;;  %vm216_vm5 = vweird.f32 %v1790_v1 }
 0x45b   :  { %1791 = vrcp.f32 %v597_v0  ;;  %vm217_vm6 = vmor %vm215_vm4, %vm216_vm5  ;;  %v609_v18 = vand.u32 2147483648, %v597_v0  ;;  %vm603_vm13 = vweird.f32 %v597_v0  ;;  %v607_v20 = vand.u32 2147483647, %v597_v0 }
 0x45c   :  { %v212_v5 = vsub.f32 1.0, %v211_v3 }
 0x45d   :  { %v610_v24 = vor.u32 1.1754944e-38, %v609_v18  ;;  %vm608_vm15 = vcmp.eq.f32.partialorder %v607_v20, 8.507059e+37 }
 0x45e   :  { %v213_v7 = vmul.f32 %v1790_v1, %v212_v5  ;;  %v236_v5 = vand.u32 2147483648, %v2201_v15 }
 0x460   :  { %v214_v10 = vadd.f32 %v1790_v1, %v213_v7  ;;  %v234_v7 = vand.u32 2147483647, %v2201_v15 }
 0x461   :  { %v1792_v2 = vpop.eup %1791 }
 0x462   :  { %v599_v4 = vmul.f32 %v1792_v2, %v597_v0  ;;  %v218_v13 = vsel %vm217_vm6, %v1790_v1, %v214_v10  ;;  %vm604_vm12 = vweird.f32 %v1792_v2  ;;  %v2240_v10 = vld [vmem:[%s2685_s8 + $0x28] sm:$0xff]  ;;  %vm235_vm3 = vcmp.eq.f32.partialorder %v234_v7, 8.507059e+37 }
 0x463   :  { %v223_v16 = vsel %vm220_vm7, %v222_v12, %v218_v13  ;;  %vm605_vm14 = vmor %vm603_vm13, %vm604_vm12  ;;  %v237_v12 = vor.u32 1.1754944e-38, %v236_v5 }
 0x464   :  { %v600_v9 = vsub.f32 1.0, %v599_v4  ;;  %v224_v19 = vmul.f32 %v223_v16, %v2201_v15  ;;  %v2243_v16 = vadd.f32 1e-06, %v2240_v10 }
 0x466   :  { %v601_v14 = vmul.f32 %v1792_v2, %v600_v9  ;;  %1793 = vlog2.f32 %v224_v19 }
 0x468   :  { %v602_v17 = vadd.f32 %v1792_v2, %v601_v14 }
 0x46a   :  { %v606_v22 = vsel %vm605_vm14, %v1792_v2, %v602_v17 }
 0x46b   :  { %v611_v26 = vsel %vm608_vm15, %v610_v24, %v606_v22 }
 0x46c   :  { %v1794_v28 = vpop.eup %1793  ;;  %v614_v30 = vmul.f32 %v611_v26, %v2165_v34 }
 0x46d   :  { %v292_v29 = vmul.f32 0.6931472, %v1794_v28 }
 0x4c9   :  { %v617_v25 = vpop.permute.xlu0 %616 }
 0x4ca   :  { %v619_v27 = vmul.f32 %v617_v25, %v611_v26 }
 0x4cc   :  { %621 = vrot.lane.b32.xlu0 %v619_v27, %s1898_s30 }
 0x4d4   :  { %315 = vrot.lane.b32.xlu0 %v292_v29, %s1894_s7  ;;  %v487_v52 = vpop.f32.mrf.mxu1 }
 0x4d5   :  { %v488_v53 = vadd.f32 %v2145_v60, %v487_v52 }
 0x53e   :  { %v622_v31 = vpop.permute.xlu0 %621 }
 0x53f   :  { %v2207_v21 = vadd.f32 %v622_v31, %v614_v30 }
 0x541   :  { %1795 = vtanh.f32 %v2207_v21 }
 0x546   :  { %v316_v32 = vpop.permute.xlu0 %315 }
 0x547   :  { %v1796_v33 = vpop.eup %1795  ;;  %338 = vrot.lane.b32.xlu0 %v316_v32, %s1895_s9 }
 0x548   :  { %627 = vrot.lane.b32.xlu1 %v1796_v33, %s1899_s0 }
 0x5b9   :  { %v339_v42 = vpop.permute.xlu0 %338 }
 0x5ba   :  { %v628_v35 = vpop.permute.xlu1 %627 }
 0x5bb   :  { %v630_v36 = vmul.f32 %v628_v35, %v611_v26 }
 0x5bd   :  { %632 = vrot.lane.b32.xlu2 %v630_v36, %s1900_s29 }
 0x5c5   :  { %120 = vrot.lane.b32.xlu2 %v98_v37, %s1894_s7 }
 0x617   :  { %v633_v34 = vpop.permute.xlu2 %632 }
 0x618   :  { %1714 = vmatmul.msk.f32.vlgmr.msrb.gmra.mxu2 %vm439_vm11, %v633_v34  ;;  %v99_v34 = vmul.f32 0.5, %v2240_v10 }
 0x619   :  { %902 = vmatpush.msrb.mxu2 %v2087_v38 }
 0x61b   :  { %903 = vmatpush.msrb.mxu2 %v2092_v39 }
 0x61f   :  { %v121_v40 = vpop.permute.xlu2 %120 }
 0x620   :  { %v2219_v41 = vadd.f32 %v121_v40, %v2198_v11 }
 0x622   :  { %v2223_v46 = vsub.f32 %v2219_v41, %v2177_v47 }
 0x624   :  { %v341_v48 = vsel %vm328_vm9, %v2223_v46, %v339_v42 }
 0x625   :  { %1698 = vmatmul.msk.f32.gmra.mxu0 %vm363_vm10, %v341_v48 }
 0x69b   :  { %v653_v54 = vpop.f32.mrf.mxu2 }
 0x69c   :  { %v656_v56 = vadd.f32 %v653_v54, %v488_v53 }
 0x69e   :  { %1797 = vtanh.f32 %v656_v56  ;;  %v1715_v61 = vmul.f32 -1.442695, %v656_v56 }
 0x6a0   :  { %1799 = vpow2.f32 %v1715_v61 }
 0x6a1   :  { %1801 = vrcp.f32 %v2201_v15 }
 0x6a2   :  { %v418_v57 = vpop.f32.mrf.mxu0 }
 0x6a3   :  { %v419_v58 = vadd.f32 %v2136_v55, %v418_v57 }
 0x6a4   :  { %v1798_v59 = vpop.eup %1797 }
 0x6a5   :  { %679 = vrot.lane.b32.xlu1 %v1798_v59, %s1897_s6  ;;  %1706 = vmatmul.msk.f32.gmra.mxu1 %vm439_vm11, %v419_v58 }
 0x6a6   :  { %v1800_v62 = vpop.eup %1799 }
 0x6a7   :  { %v660_v63 = vadd.f32 1.0, %v1800_v62  ;;  %v1802_v0 = vpop.eup %1801 }
 0x6a8   :  { %v226_v2 = vmul.f32 %v1802_v0, %v2201_v15  ;;  %vm231_vm1 = vweird.f32 %v1802_v0 }
 0x6a9   :  { %1803 = vrcp.f32 %v660_v63  ;;  %vm232_vm2 = vmor %vm230_vm0, %vm231_vm1  ;;  %v672_v19 = vand.u32 2147483648, %v660_v63  ;;  %vm666_vm5 = vweird.f32 %v660_v63  ;;  %v670_v20 = vand.u32 2147483647, %v660_v63 }
 0x6aa   :  { %v227_v4 = vsub.f32 1.0, %v226_v2  ;;  %vm245_vm0 = vweird.f32 %v2243_v16 }
 0x6ab   :  { %v673_v24 = vor.u32 1.1754944e-38, %v672_v19  ;;  %vm671_vm7 = vcmp.eq.f32.partialorder %v670_v20, 8.507059e+37  ;;  %v2283_v20 = vld [vmem:[%s2685_s8 + $0x30] sm:$0xff] }
 0x6ac   :  { %v228_v6 = vmul.f32 %v1802_v0, %v227_v4 }
 0x6ae   :  { %v229_v9 = vadd.f32 %v1802_v0, %v228_v6 }
 0x6af   :  { %v1804_v1 = vpop.eup %1803 }
 0x6b0   :  { %v662_v3 = vmul.f32 %v1804_v1, %v660_v63  ;;  %v233_v13 = vsel %vm232_vm2, %v1802_v0, %v229_v9  ;;  %vm667_vm4 = vweird.f32 %v1804_v1 }
 0x6b1   :  { %v238_v17 = vsel %vm235_vm3, %v237_v12, %v233_v13  ;;  %vm668_vm6 = vmor %vm666_vm5, %vm667_vm4 }
 0x6b2   :  { %v663_v8 = vsub.f32 1.0, %v662_v3  ;;  %v239_v15 = vmul.f32 %v238_v17, %v2243_v16 }
 0x6b4   :  { %v664_v14 = vmul.f32 %v1804_v1, %v663_v8  ;;  %1805 = vlog2.f32 %v239_v15  ;;  %v249_v15 = vand.u32 2147483647, %v2243_v16 }
 0x6b6   :  { %v665_v18 = vadd.f32 %v1804_v1, %v664_v14  ;;  %vm250_vm3 = vcmp.eq.f32.partialorder %v249_v15, 8.507059e+37 }
 0x6b8   :  { %v669_v22 = vsel %vm668_vm6, %v1804_v1, %v665_v18  ;;  %v251_v18 = vand.u32 2147483648, %v2243_v16 }
 0x6b9   :  { %v674_v26 = vsel %vm671_vm7, %v673_v24, %v669_v22 }
 0x6ba   :  { %v1806_v28 = vpop.eup %1805  ;;  %v677_v30 = vmul.f32 %v674_v26, %v2207_v21  ;;  %v252_v24 = vor.u32 1.1754944e-38, %v251_v18 }
 0x6bb   :  { %v294_v29 = vmul.f32 0.6931472, %v1806_v28 }
 0x717   :  { %v680_v25 = vpop.permute.xlu1 %679 }
 0x718   :  { %v682_v27 = vmul.f32 %v680_v25, %v674_v26  ;;  %v2286_v25 = vadd.f32 1e-06, %v2283_v20 }
 0x71a   :  { %684 = vrot.lane.b32.xlu1 %v682_v27, %s1898_s30  ;;  %vm260_vm4 = vweird.f32 %v2286_v25 }
 0x722   :  { %317 = vrot.lane.b32.xlu1 %v294_v29, %s1894_s7  ;;  %v490_v54 = vpop.f32.mrf.mxu1 }
 0x723   :  { %v491_v56 = vadd.f32 %v2145_v60, %v490_v54 }
 0x78c   :  { %v685_v31 = vpop.permute.xlu1 %684 }
 0x78d   :  { %v2249_v32 = vadd.f32 %v685_v31, %v677_v30 }
 0x78f   :  { %1807 = vtanh.f32 %v2249_v32 }
 0x794   :  { %v318_v35 = vpop.permute.xlu1 %317 }
 0x795   :  { %v1808_v33 = vpop.eup %1807  ;;  %342 = vrot.lane.b32.xlu1 %v318_v35, %s1895_s9 }
 0x796   :  { %690 = vrot.lane.b32.xlu2 %v1808_v33, %s1899_s0 }
 0x7f0   :  { %v691_v36 = vpop.permute.xlu2 %690 }
 0x7f1   :  { %v693_v37 = vmul.f32 %v691_v36, %v674_v26 }
 0x7f3   :  { %695 = vrot.lane.b32.xlu0 %v693_v37, %s1900_s29 }
 0x7fb   :  { %122 = vrot.lane.b32.xlu0 %v99_v34, %s1894_s7 }
 0x807   :  { %v343_v48 = vpop.permute.xlu1 %342 }
 0x865   :  { %v696_v21 = vpop.permute.xlu0 %695 }
 0x866   :  { %1716 = vmatmul.msk.f32.vlgmr.msrb.gmra.mxu3 %vm439_vm11, %v696_v21 }
 0x867   :  { %965 = vmatpush.msrb.mxu3 %v2087_v38 }
 0x869   :  { %966 = vmatpush.msrb.mxu3 %v2092_v39 }
 0x86d   :  { %v123_v40 = vpop.permute.xlu0 %122 }
 0x86e   :  { %v2261_v42 = vadd.f32 %v123_v40, %v2240_v10  ;;  %v100_v40 = vmul.f32 0.5, %v2283_v20 }
 0x870   :  { %v2265_v52 = vsub.f32 %v2261_v42, %v2219_v41 }
 0x872   :  { %v345_v53 = vsel %vm328_vm9, %v2265_v52, %v343_v48 }
 0x873   :  { %1699 = vmatmul.msk.f32.gmra.mxu0 %vm363_vm10, %v345_v53 }
 0x8e9   :  { %v716_v38 = vpop.f32.mrf.mxu3 }
 0x8ea   :  { %v719_v57 = vadd.f32 %v716_v38, %v491_v56 }
 0x8ec   :  { %1809 = vtanh.f32 %v719_v57  ;;  %v1717_v61 = vmul.f32 -1.442695, %v719_v57 }
 0x8ee   :  { %1811 = vpow2.f32 %v1717_v61 }
 0x8f0   :  { %v421_v39 = vpop.f32.mrf.mxu0 }
 0x8f1   :  { %v422_v58 = vadd.f32 %v2136_v55, %v421_v39 }
 0x8f2   :  { %v1810_v59 = vpop.eup %1809 }
 0x8f3   :  { %742 = vrot.lane.b32.xlu2 %v1810_v59, %s1897_s6  ;;  %1707 = vmatmul.msk.f32.gmra.mxu1 %vm439_vm11, %v422_v58 }
 0x8f4   :  { %v1812_v62 = vpop.eup %1811 }
 0x8f5   :  { %v723_v63 = vadd.f32 1.0, %v1812_v62 }
 0x8f7   :  { %1813 = vrcp.f32 %v723_v63  ;;  %v735_v5 = vand.u32 2147483648, %v723_v63  ;;  %vm729_vm13 = vweird.f32 %v723_v63  ;;  %v733_v6 = vand.u32 2147483647, %v723_v63 }
 0x8f8   :  { %1815 = vrcp.f32 %v2243_v16 }
 0x8f9   :  { %v736_v8 = vor.u32 1.1754944e-38, %v735_v5  ;;  %vm734_vm15 = vcmp.eq.f32.partialorder %v733_v6, 8.507059e+37 }
 0x8fd   :  { %v1814_v0 = vpop.eup %1813 }
 0x8fe   :  { %v725_v1 = vmul.f32 %v1814_v0, %v723_v63  ;;  %vm730_vm12 = vweird.f32 %v1814_v0  ;;  %v1816_v14 = vpop.eup %1815 }
 0x8ff   :  { %vm731_vm14 = vmor %vm729_vm13, %vm730_vm12  ;;  %v241_v17 = vmul.f32 %v1816_v14, %v2243_v16  ;;  %vm246_vm1 = vweird.f32 %v1816_v14 }
 0x900   :  { %v726_v2 = vsub.f32 1.0, %v725_v1  ;;  %vm247_vm2 = vmor %vm245_vm0, %vm246_vm1 }
 0x901   :  { %v242_v19 = vsub.f32 1.0, %v241_v17  ;;  %v2322_v17 = vld [vmem:[%s2685_s8 + $0x38] sm:$0xff] }
 0x902   :  { %v727_v3 = vmul.f32 %v1814_v0, %v726_v2 }
 0x903   :  { %v243_v22 = vmul.f32 %v1816_v14, %v242_v19 }
 0x904   :  { %v728_v4 = vadd.f32 %v1814_v0, %v727_v3 }
 0x905   :  { %v244_v26 = vadd.f32 %v1816_v14, %v243_v22  ;;  %v2325_v22 = vadd.f32 1e-06, %v2322_v17 }
 0x906   :  { %v732_v7 = vsel %vm731_vm14, %v1814_v0, %v728_v4 }
 0x907   :  { %v737_v12 = vsel %vm734_vm15, %v736_v8, %v732_v7  ;;  %v248_v27 = vsel %vm247_vm2, %v1816_v14, %v244_v26  ;;  %v266_v8 = vand.u32 2147483648, %v2286_v25  ;;  %vm275_vm0 = vweird.f32 %v2325_v22 }
 0x908   :  { %v253_v28 = vsel %vm250_vm3, %v252_v24, %v248_v27  ;;  %v740_v31 = vmul.f32 %v737_v12, %v2249_v32 }
 0x909   :  { %v254_v29 = vmul.f32 %v253_v28, %v2286_v25  ;;  %v267_v18 = vor.u32 1.1754944e-38, %v266_v8 }
 0x90b   :  { %1817 = vlog2.f32 %v254_v29 }
 0x911   :  { %v1818_v30 = vpop.eup %1817 }
 0x912   :  { %v296_v16 = vmul.f32 0.6931472, %v1818_v30 }
 0x94d   :  { %v743_v9 = vpop.permute.xlu2 %742 }
 0x94e   :  { %v745_v13 = vmul.f32 %v743_v9, %v737_v12 }
 0x950   :  { %747 = vrot.lane.b32.xlu2 %v745_v13, %s1898_s30 }
 0x958   :  { %319 = vrot.lane.b32.xlu2 %v296_v16, %s1894_s7 }
 0x970   :  { %v493_v57 = vpop.f32.mrf.mxu1 }
 0x971   :  { %v494_v39 = vadd.f32 %v2145_v60, %v493_v57  ;;  %v101_v57 = vmul.f32 0.5, %v2322_v17 }
 0x9aa   :  { %v748_v33 = vpop.permute.xlu2 %747 }
 0x9ab   :  { %v2291_v35 = vadd.f32 %v748_v33, %v740_v31 }
 0x9ad   :  { %1819 = vtanh.f32 %v2291_v35 }
 0x9b2   :  { %v320_v37 = vpop.permute.xlu2 %319 }
 0x9b3   :  { %v1820_v36 = vpop.eup %1819  ;;  %346 = vrot.lane.b32.xlu2 %v320_v37, %s1895_s9 }
 0x9b4   :  { %753 = vrot.lane.b32.xlu0 %v1820_v36, %s1899_s0 }
 0xa0d   :  { %v347_v54 = vpop.permute.xlu2 %346 }
 0xa26   :  { %v754_v34 = vpop.permute.xlu0 %753 }
 0xa27   :  { %v756_v21 = vmul.f32 %v754_v34, %v737_v12  ;;  %v264_v12 = vand.u32 2147483647, %v2286_v25 }
 0xa29   :  { %758 = vrot.lane.b32.xlu1 %v756_v21, %s1900_s29  ;;  %vm265_vm7 = vcmp.eq.f32.partialorder %v264_v12, 8.507059e+37 }
 0xa31   :  { %124 = vrot.lane.b32.xlu1 %v100_v40, %s1894_s7 }
 0xa9b   :  { %v759_v32 = vpop.permute.xlu1 %758 }
 0xa9c   :  { %1718 = vmatmul.msk.f32.vlgmr.msra.gmra.mxu2 %vm439_vm11, %v759_v32 }
 0xaa3   :  { %v125_v48 = vpop.permute.xlu1 %124 }
 0xaa4   :  { %v2301_v53 = vadd.f32 %v125_v48, %v2283_v20 }
 0xaa6   :  { %v2305_v56 = vsub.f32 %v2301_v53, %v2261_v42 }
 0xaa8   :  { %v349_v38 = vsel %vm328_vm9, %v2305_v56, %v347_v54 }
 0xaa9   :  { %1700 = vmatmul.msk.f32.gmra.mxu0 %vm363_vm10, %v349_v38 }
 0xb1f   :  { %v779_v58 = vpop.f32.mrf.mxu2 }
 0xb20   :  { %v782_v59 = vadd.f32 %v779_v58, %v494_v39 }
 0xb22   :  { %1821 = vtanh.f32 %v782_v59  ;;  %v1719_v0 = vmul.f32 -1.442695, %v782_v59 }
 0xb24   :  { %1823 = vpow2.f32 %v1719_v0 }
 0xb25   :  { %1825 = vrcp.f32 %v2286_v25 }
 0xb26   :  { %v424_v61 = vpop.f32.mrf.mxu0 }
 0xb27   :  { %v425_v62 = vadd.f32 %v2136_v55, %v424_v61 }
 0xb28   :  { %v1822_v63 = vpop.eup %1821 }
 0xb29   :  { %805 = vrot.lane.b32.xlu0 %v1822_v63, %s1897_s6  ;;  %1708 = vmatmul.msk.f32.gmra.mxu1 %vm439_vm11, %v425_v62 }
 0xb2a   :  { %v1824_v1 = vpop.eup %1823 }
 0xb2b   :  { %v786_v2 = vadd.f32 1.0, %v1824_v1  ;;  %v1826_v3 = vpop.eup %1825 }
 0xb2c   :  { %v256_v5 = vmul.f32 %v1826_v3, %v2286_v25  ;;  %vm261_vm5 = vweird.f32 %v1826_v3 }
 0xb2d   :  { %1827 = vrcp.f32 %v786_v2  ;;  %vm262_vm6 = vmor %vm260_vm4, %vm261_vm5  ;;  %v798_v27 = vand.u32 2147483648, %v786_v2  ;;  %vm792_vm13 = vweird.f32 %v786_v2  ;;  %v796_v28 = vand.u32 2147483647, %v786_v2 }
 0xb2e   :  { %v257_v7 = vsub.f32 1.0, %v256_v5 }
 0xb2f   :  { %v799_v30 = vor.u32 1.1754944e-38, %v798_v27  ;;  %vm797_vm15 = vcmp.eq.f32.partialorder %v796_v28, 8.507059e+37 }
 0xb30   :  { %v258_v9 = vmul.f32 %v1826_v3, %v257_v7 }
 0xb32   :  { %v259_v14 = vadd.f32 %v1826_v3, %v258_v9 }
 0xb33   :  { %v1828_v4 = vpop.eup %1827 }
 0xb34   :  { %v788_v6 = vmul.f32 %v1828_v4, %v786_v2  ;;  %v263_v19 = vsel %vm262_vm6, %v1826_v3, %v259_v14  ;;  %vm793_vm12 = vweird.f32 %v1828_v4 }
 0xb35   :  { %v268_v24 = vsel %vm265_vm7, %v267_v18, %v263_v19  ;;  %vm794_vm14 = vmor %vm792_vm13, %vm793_vm12 }
 0xb36   :  { %v789_v13 = vsub.f32 1.0, %v788_v6  ;;  %v269_v25 = vmul.f32 %v268_v24, %v2325_v22 }
 0xb38   :  { %v790_v15 = vmul.f32 %v1828_v4, %v789_v13  ;;  %1829 = vlog2.f32 %v269_v25  ;;  %v93_v25 = vld [vmem:[%s2685_s8 + $0x40] sm:$0xff] }
 0xb3a   :  { %v791_v26 = vadd.f32 %v1828_v4, %v790_v15  ;;  %v281_v15 = vand.u32 2147483648, %v2325_v22 }
 0xb3c   :  { %v795_v29 = vsel %vm794_vm14, %v1828_v4, %v791_v26  ;;  %v279_v26 = vand.u32 2147483647, %v2325_v22  ;;  %v282_v28 = vor.u32 1.1754944e-38, %v281_v15 }
 0xb3d   :  { %v800_v31 = vsel %vm797_vm15, %v799_v30, %v795_v29 }
 0xb3e   :  { %v1830_v36 = vpop.eup %1829  ;;  %v803_v34 = vmul.f32 %v800_v31, %v2291_v35  ;;  %vm280_vm3 = vcmp.eq.f32.partialorder %v279_v26, 8.507059e+37 }
 0xb3f   :  { %v298_v37 = vmul.f32 0.6931472, %v1830_v36 }
 0xb9b   :  { %v806_v16 = vpop.permute.xlu0 %805 }
 0xb9c   :  { %v808_v33 = vmul.f32 %v806_v16, %v800_v31  ;;  %v163_v16 = vadd.f32 1e-06, %v93_v25 }
 0xb9e   :  { %810 = vrot.lane.b32.xlu0 %v808_v33, %s1898_s30 }
 0xba6   :  { %321 = vrot.lane.b32.xlu0 %v298_v37, %s1894_s7  ;;  %v496_v63 = vpop.f32.mrf.mxu1 }
 0xba7   :  { %v497_v0 = vadd.f32 %v2145_v60, %v496_v63 }
 0xc10   :  { %v811_v21 = vpop.permute.xlu0 %810 }
 0xc11   :  { %v2331_v40 = vadd.f32 %v811_v21, %v803_v34 }
 0xc13   :  { %1831 = vtanh.f32 %v2331_v40 }
 0xc18   :  { %v322_v32 = vpop.permute.xlu0 %321 }
 0xc19   :  { %v1832_v48 = vpop.eup %1831  ;;  %350 = vrot.lane.b32.xlu0 %v322_v32, %s1895_s9 }
 0xc1a   :  { %816 = vrot.lane.b32.xlu1 %v1832_v48, %s1899_s0 }
 0xc8b   :  { %v351_v59 = vpop.permute.xlu0 %350 }
 0xc8c   :  { %v817_v54 = vpop.permute.xlu1 %816 }
 0xc8d   :  { %v819_v38 = vmul.f32 %v817_v54, %v800_v31 }
 0xc8f   :  { %821 = vrot.lane.b32.xlu2 %v819_v38, %s1900_s29 }
 0xc97   :  { %126 = vrot.lane.b32.xlu2 %v101_v57, %s1894_s7 }
 0xce9   :  { %v822_v35 = vpop.permute.xlu2 %821 }
 0xcea   :  { %1720 = vmatmul.msk.f32.vlgmr.msra.gmra.mxu3 %vm439_vm11, %v822_v35 }
 0xcf1   :  { %v127_v39 = vpop.permute.xlu2 %126 }
 0xcf2   :  { %v2341_v58 = vadd.f32 %v127_v39, %v2322_v17 }
 0xcf4   :  { %v2345_v61 = vsub.f32 %v2341_v58, %v2301_v53 }
 0xcf6   :  { %v353_v62 = vsel %vm328_vm9, %v2345_v61, %v351_v59 }
 0xcf7   :  { %1701 = vmatmul.msk.f32.gmra.mxu0 %vm363_vm10, %v353_v62 }
 0xd6d   :  { %v842_v1 = vpop.f32.mrf.mxu3 }
 0xd6e   :  { %v845_v2 = vadd.f32 %v842_v1, %v497_v0  ;;  %v2373_v0 = vld [vmem:[%s2685_s8 + $0x10] sm:$0xff] }
 0xd70   :  { %1833 = vtanh.f32 %v845_v2  ;;  %v1721_v6 = vmul.f32 -1.442695, %v845_v2 }
 0xd72   :  { %1835 = vpow2.f32 %v1721_v6  ;;  %v1014_v6 = vadd.f32 1e-06, %v2261_v42 }
 0xd73   :  { %1837 = vrcp.f32 %v2325_v22 }
 0xd74   :  { %v427_v3 = vpop.f32.mrf.mxu0 }
 0xd75   :  { %v428_v4 = vadd.f32 %v2136_v55, %v427_v3  ;;  %v102_v3 = vmul.f32 0.5, %v93_v25 }
 0xd76   :  { %v1834_v5 = vpop.eup %1833 }
 0xd77   :  { %868 = vrot.lane.b32.xlu1 %v1834_v5, %s1897_s6  ;;  %1709 = vmatmul.msk.f32.gmra.mxu1 %vm439_vm11, %v428_v4  ;;  %v2386_v4 = vld [vmem:[%s2685_s8 + $0x8] sm:$0xff]  ;;  %v1011_v5 = vadd.f32 1e-06, %v2118_v49 }
 0xd78   :  { %v1836_v7 = vpop.eup %1835 }
 0xd79   :  { %v849_v8 = vadd.f32 1.0, %v1836_v7  ;;  %v1838_v9 = vpop.eup %1837  ;;  %v2401_v7 = vld [vmem:[%s2685_s8] sm:$0xff] }
 0xd7a   :  { %v271_v12 = vmul.f32 %v1838_v9, %v2325_v22  ;;  %vm276_vm1 = vweird.f32 %v1838_v9 }
 0xd7b   :  { %1839 = vrcp.f32 %v849_v8  ;;  %vm277_vm2 = vmor %vm275_vm0, %vm276_vm1  ;;  %v861_v36 = vand.u32 2147483648, %v849_v8  ;;  %vm855_vm5 = vweird.f32 %v849_v8  ;;  %v859_v34 = vand.u32 2147483647, %v849_v8 }
 0xd7c   :  { %v272_v13 = vsub.f32 1.0, %v271_v12 }
 0xd7d   :  { %v862_v21 = vor.u32 1.1754944e-38, %v861_v36  ;;  %vm860_vm7 = vcmp.eq.f32.partialorder %v859_v34, 8.507059e+37 }
 0xd7e   :  { %v273_v18 = vmul.f32 %v1838_v9, %v272_v13 }
 0xd80   :  { %v274_v24 = vadd.f32 %v1838_v9, %v273_v18 }
 0xd81   :  { %v1840_v14 = vpop.eup %1839 }
 0xd82   :  { %v851_v19 = vmul.f32 %v1840_v14, %v849_v8  ;;  %v278_v29 = vsel %vm277_vm2, %v1838_v9, %v274_v24  ;;  %vm856_vm4 = vweird.f32 %v1840_v14 }
 0xd83   :  { %v283_v31 = vsel %vm280_vm3, %v282_v28, %v278_v29  ;;  %vm857_vm6 = vmor %vm855_vm5, %vm856_vm4 }
 0xd84   :  { %v852_v27 = vsub.f32 1.0, %v851_v19  ;;  %v284_v37 = vmul.f32 %v283_v31, %v163_v16 }
 0xd86   :  { %v853_v30 = vmul.f32 %v1840_v14, %v852_v27  ;;  %1841 = vlog2.f32 %v284_v37 }
 0xd88   :  { %v854_v33 = vadd.f32 %v1840_v14, %v853_v30 }
 0xd8a   :  { %v858_v22 = vsel %vm857_vm6, %v1840_v14, %v854_v33 }
 0xd8b   :  { %v863_v48 = vsel %vm860_vm7, %v862_v21, %v858_v22 }
 0xd8c   :  { %v1842_v38 = vpop.eup %1841  ;;  %v866_v35 = vmul.f32 %v863_v48, %v2331_v40  ;;  %v1012_v40 = vadd.f32 1e-06, %v2177_v47 }
 0xd8d   :  { %v300_v57 = vmul.f32 0.6931472, %v1842_v38  ;;  %v1013_v38 = vadd.f32 1e-06, %v2219_v41 }
 0xde9   :  { %v869_v32 = vpop.permute.xlu1 %868 }
 0xdea   :  { %v871_v54 = vmul.f32 %v869_v32, %v863_v48 }
 0xdec   :  { %873 = vrot.lane.b32.xlu1 %v871_v54, %s1898_s30  ;;  %v1009_v54 = vadd.f32 1e-06, %v2105_v43 }
 0xdf4   :  { %323 = vrot.lane.b32.xlu1 %v300_v57, %s1894_s7  ;;  %v499_v18 = vpop.f32.mrf.mxu1  ;;  %v1016_v57 = vadd.f32 1e-06, %v2341_v58 }
 0xdf5   :  { %v500_v19 = vadd.f32 %v2145_v60, %v499_v18 }
 0xe5e   :  { %v874_v39 = vpop.permute.xlu1 %873 }
 0xe5f   :  { %v2365_v59 = vadd.f32 %v874_v39, %v866_v35 }
 0xe61   :  { %1843 = vtanh.f32 %v2365_v59 }
 0xe66   :  { %v324_v62 = vpop.permute.xlu1 %323 }
 0xe67   :  { %v1844_v63 = vpop.eup %1843  ;;  %354 = vrot.lane.b32.xlu1 %v324_v62, %s1895_s9 }
 0xe68   :  { %879 = vrot.lane.b32.xlu2 %v1844_v63, %s1899_s0 }
 0xe6f   :  { %1181 = vrot.lane.b32.xlu1 %v2373_v0, %s1894_s7 }
 0xe77   :  { %1187 = vrot.lane.b32.xlu1 %v2240_v10, %s1894_s7 }
 0xe7f   :  { %1031 = vrot.lane.b32.xlu1 %v1012_v40, %s1895_s9 }
 0xec2   :  { %v880_v1 = vpop.permute.xlu2 %879 }
 0xec3   :  { %v882_v2 = vmul.f32 %v880_v1, %v863_v48 }
 0xec5   :  { %884 = vrot.lane.b32.xlu0 %v882_v2, %s1900_s29 }
 0xecd   :  { %128 = vrot.lane.b32.xlu0 %v102_v3, %s1894_s7 }
 0xed5   :  { %1179 = vrot.lane.b32.xlu0 %v2386_v4, %s1894_s7 }
 0xed9   :  { %v355_v13 = vpop.permute.xlu1 %354 }
 0xedd   :  { %1185 = vrot.lane.b32.xlu0 %v2198_v11, %s1894_s7 }
 0xee1   :  { %v1182_v2 = vpop.permute.xlu1 %1181 }
 0xee5   :  { %1191 = vrot.lane.b32.xlu0 %v2322_v17, %s1894_s7 }
 0xeed   :  { %1029 = vrot.lane.b32.xlu0 %v1011_v5, %s1895_s9 }
 0xef5   :  { %1035 = vrot.lane.b32.xlu0 %v1014_v6, %s1895_s9  ;;  %v1203_v6 = vadd.f32 %v1182_v2, %v2118_v49 }
 0xefd   :  { %1177 = vrot.lane.b32.xlu0 %v2401_v7, %s1894_s7 }
 0xf37   :  { %v885_v11 = vpop.permute.xlu0 %884 }
 0xf38   :  { %1722 = vmatmul.msk.f32.vlgmr.msrb.gmra.mxu2 %vm439_vm11, %v885_v11 }
 0xf3f   :  { %v129_v8 = vpop.permute.xlu0 %128 }
 0xf40   :  { %v2406_v9 = vadd.f32 %v129_v8, %v93_v25 }
 0xf42   :  { %v155_v12 = vsub.f32 %v2406_v9, %v2341_v58 }
 0xf44   :  { %v2411_v14 = vsel %vm328_vm9, %v155_v12, %v355_v13 }
 0xf45   :  { %1702 = vmatmul.msk.f32.gmra.mxu0 %vm363_vm10, %v2411_v14 }
 0xf47   :  { %v1180_v35 = vpop.permute.xlu0 %1179 }
 0xf4f   :  { %v1186_v39 = vpop.permute.xlu0 %1185 }
 0xf50   :  { %v1205_v11 = vadd.f32 %v1186_v39, %v2219_v41 }
 0xf57   :  { %v1192_v62 = vpop.permute.xlu0 %1191 }
 0xf58   :  { %v1208_v41 = vadd.f32 %v1192_v62, %v2341_v58 }
 0xf5f   :  { %v1030_v40 = vpop.permute.xlu0 %1029 }
 0xf60   :  { %v1090_v58 = vand.u32 2147483648, %v1030_v40  ;;  %vm1084_vm1 = vweird.f32 %v1030_v40 }
 0xfbb   :  { %v905_v15 = vpop.f32.mrf.mxu2 }
 0xfbc   :  { %v908_v24 = vadd.f32 %v905_v15, %v500_v19  ;;  %v1188_v19 = vpop.permute.xlu1 %1187 }
 0xfbd   :  { %v1206_v49 = vadd.f32 %v1188_v19, %v2261_v42 }
 0xfbe   :  { %1845 = vtanh.f32 %v908_v24  ;;  %v1723_v28 = vmul.f32 -1.442695, %v908_v24  ;;  %v1015_v24 = vadd.f32 1e-06, %v2301_v53 }
 0xfc0   :  { %1847 = vpow2.f32 %v1723_v28  ;;  %v1202_v28 = vadd.f32 %v1180_v35, %v2108_v44 }
 0xfc2   :  { %v430_v26 = vpop.f32.mrf.mxu0 }
 0xfc3   :  { %v431_v27 = vadd.f32 %v2136_v55, %v430_v26 }
 0xfc4   :  { %v1846_v25 = vpop.eup %1845 }
 0xfc5   :  { %931 = vrot.lane.b32.xlu2 %v1846_v25, %s1897_s6  ;;  %1710 = vmatmul.msk.f32.gmra.mxu1 %vm439_vm11, %v431_v27 }
 0xfc6   :  { %v1848_v29 = vpop.eup %1847 }
 0xfc7   :  { %v912_v30 = vadd.f32 1.0, %v1848_v29 }
 0xfc9   :  { %1849 = vrcp.f32 %v912_v30  ;;  %v924_v37 = vand.u32 2147483648, %v912_v30  ;;  %vm918_vm13 = vweird.f32 %v912_v30  ;;  %v922_v34 = vand.u32 2147483647, %v912_v30 }
 0xfcb   :  { %v925_v22 = vor.u32 1.1754944e-38, %v924_v37  ;;  %vm923_vm15 = vcmp.eq.f32.partialorder %v922_v34, 8.507059e+37  ;;  %v1213_v34 = vsub.f32 %v1206_v49, %v1205_v11 }
 0xfcf   :  { %v1850_v16 = vpop.eup %1849 }
 0xfd0   :  { %v914_v31 = vmul.f32 %v1850_v16, %v912_v30  ;;  %vm919_vm12 = vweird.f32 %v1850_v16  ;;  %v1036_v30 = vpop.permute.xlu0 %1035 }
 0xfd1   :  { %vm920_vm14 = vmor %vm918_vm13, %vm919_vm12  ;;  %vm1129_vm13 = vweird.f32 %v1036_v30 }
 0xfd2   :  { %v915_v33 = vsub.f32 1.0, %v914_v31 }
 0xfd4   :  { %v916_v60 = vmul.f32 %v1850_v16, %v915_v33  ;;  %v1088_v33 = vand.u32 2147483647, %v1030_v40 }
 0xfd6   :  { %v917_v36 = vadd.f32 %v1850_v16, %v916_v60  ;;  %vm1089_vm3 = vcmp.eq.f32.partialorder %v1088_v33, 8.507059e+37 }
 0xfd8   :  { %v921_v55 = vsel %vm920_vm14, %v1850_v16, %v917_v36  ;;  %v1210_v16 = vsub.f32 %v1203_v6, %v1202_v28  ;;  %v1091_v36 = vor.u32 1.1754944e-38, %v1090_v58 }
 0xfd9   :  { %v2419_v32 = vsel %vm923_vm15, %v925_v22, %v921_v55 }
0x101f   :  { %v932_v21 = vpop.permute.xlu2 %931 }
0x1020   :  { %v934_v48 = vmul.f32 %v932_v21, %v2419_v32  ;;  %v1178_v21 = vpop.permute.xlu0 %1177 }
0x1022   :  { %936 = vrot.lane.b32.xlu2 %v934_v48, %s1898_s30 }
0x102a   :  { %1183 = vrot.lane.b32.xlu2 %v2158_v23, %s1894_s7  ;;  %v929_v23 = vmul.f32 %v2419_v32, %v2365_v59 }
0x1032   :  { %1189 = vrot.lane.b32.xlu2 %v2283_v20, %s1894_s7 }
0x103a   :  { %1025 = vrot.lane.b32.xlu2 %v1009_v54, %s1895_s9 }
0x1042   :  { %1033 = vrot.lane.b32.xlu2 %v1013_v38, %s1895_s9 }
0x104a   :  { %1039 = vrot.lane.b32.xlu2 %v1016_v57, %s1895_s9 }
0x107c   :  { %v937_v63 = vpop.permute.xlu2 %936 }
0x107d   :  { %v2435_v1 = vadd.f32 %v937_v63, %v929_v23 }
0x107f   :  { %1851 = vtanh.f32 %v2435_v1 }
0x1080   :  { %1853 = vrcp.f32 %v1030_v40 }
0x1084   :  { %v1184_v3 = vpop.permute.xlu2 %1183 }
0x1085   :  { %v1852_v5 = vpop.eup %1851  ;;  %v1204_v8 = vadd.f32 %v1184_v3, %v2177_v47 }
0x1086   :  { %v1854_v12 = vpop.eup %1853  ;;  %942 = vrot.lane.b32.xlu1 %v1852_v5, %s1899_s0 }
0x1087   :  { %v1211_v59 = vsub.f32 %v1204_v8, %v1203_v6  ;;  %v1212_v13 = vsub.f32 %v1205_v11, %v1204_v8  ;;  %v1080_v18 = vmul.f32 %v1854_v12, %v1030_v40  ;;  %vm1085_vm0 = vweird.f32 %v1854_v12  ;;  %v1032_v8 = vpop.permute.xlu1 %1031 }
0x1088   :  { %vm1086_vm2 = vmor %vm1084_vm1, %vm1085_vm0  ;;  %vm1099_vm1 = vweird.f32 %v1032_v8 }
0x1089   :  { %1267 = vrot.lane.b32.xlu2 %v1211_v59, %s1895_s9  ;;  %1272 = vrot.lane.b32.xlu0 %v1212_v13, %s1895_s9  ;;  %v1081_v26 = vsub.f32 1.0, %v1080_v18  ;;  %v1135_v59 = vand.u32 2147483648, %v1036_v30  ;;  %v1133_v18 = vand.u32 2147483647, %v1036_v30 }
0x108b   :  { %v1082_v29 = vmul.f32 %v1854_v12, %v1081_v26  ;;  %vm1134_vm15 = vcmp.eq.f32.partialorder %v1133_v18, 8.507059e+37 }
0x108c   :  { %v1190_v15 = vpop.permute.xlu2 %1189 }
0x108d   :  { %v1207_v47 = vadd.f32 %v1190_v15, %v2301_v53  ;;  %v1083_v42 = vadd.f32 %v1854_v12, %v1082_v29  ;;  %v1010_v53 = vadd.f32 1e-06, %v2108_v44  ;;  %v1201_v44 = vadd.f32 %v1178_v21, %v2105_v43 }
0x108e   :  { %1037 = vrot.lane.b32.xlu1 %v1015_v24, %s1895_s9  ;;  %v1136_v15 = vor.u32 1.1754944e-38, %v1135_v59 }
0x108f   :  { %v1214_v27 = vsub.f32 %v1207_v47, %v1206_v49  ;;  %v1215_v25 = vsub.f32 %v1208_v41, %v1207_v47  ;;  %v1087_v60 = vsel %vm1086_vm2, %v1854_v12, %v1083_v42  ;;  %v1209_v23 = vsub.f32 %v1202_v28, %v1201_v44 }
0x1090   :  { %v1092_v22 = vsel %vm1089_vm3, %v1091_v36, %v1087_v60  ;;  %v1890_v36 = vld [vmem:[%s2685_s8 + $0x18] sm:$0xff] }
0x1091   :  { %1282 = vrot.lane.b32.xlu2 %v1214_v27, %s1895_s9  ;;  %1287 = vrot.lane.b32.xlu0 %v1215_v25, %s1895_s9  ;;  %v1093_v38 = vmul.f32 %v2373_v0, %v1092_v22 }
0x1094   :  { %v1026_v31 = vpop.permute.xlu2 %1025 }
0x1095   :  { %1855 = vrcp.f32 %v1026_v31  ;;  %v1060_v54 = vand.u32 2147483648, %v1026_v31  ;;  %v1058_v35 = vand.u32 2147483647, %v1026_v31  ;;  %vm1054_vm5 = vweird.f32 %v1026_v31 }
0x1096   :  { %1262 = vrot.lane.b32.xlu1 %v1210_v16, %s1895_s9  ;;  %1857 = vrcp.f32 %v1036_v30 }
0x1097   :  { %v1061_v62 = vor.u32 1.1754944e-38, %v1060_v54  ;;  %vm1059_vm7 = vcmp.eq.f32.partialorder %v1058_v35, 8.507059e+37  ;;  %1859 = vrcp.f32 %v1032_v8 }
0x1099   :  { %1027 = vrot.lane.b32.xlu2 %v1010_v53, %s1895_s9 }
0x109b   :  { %v1856_v37 = vpop.eup %1855 }
0x109c   :  { %v1050_v55 = vmul.f32 %v1856_v37, %v1026_v31  ;;  %vm1055_vm4 = vweird.f32 %v1856_v37  ;;  %v2462_v43 = vpop.permute.xlu2 %1033  ;;  %v1858_v0 = vpop.eup %1857 }
0x109d   :  { %vm1056_vm6 = vmor %vm1054_vm5, %vm1055_vm4  ;;  %v1125_v3 = vmul.f32 %v1858_v0, %v1036_v30  ;;  %vm1130_vm12 = vweird.f32 %v1858_v0  ;;  %v1860_v24 = vpop.eup %1859  ;;  %1861 = vrcp.f32 %v2462_v43  ;;  %v1105_v30 = vand.u32 2147483648, %v1032_v8 }
0x109e   :  { %v1051_v48 = vsub.f32 1.0, %v1050_v55  ;;  %1277 = vrot.lane.b32.xlu1 %v1213_v34, %s1895_s9  ;;  %vm1131_vm14 = vmor %vm1129_vm13, %vm1130_vm12  ;;  %v1095_v41 = vmul.f32 %v1860_v24, %v1032_v8  ;;  %vm1100_vm0 = vweird.f32 %v1860_v24  ;;  %v1120_v21 = vand.u32 2147483648, %v2462_v43 }
0x109f   :  { %v1126_v5 = vsub.f32 1.0, %v1125_v3  ;;  %vm1101_vm2 = vmor %vm1099_vm1, %vm1100_vm0  ;;  %v1106_v53 = vor.u32 1.1754944e-38, %v1105_v30  ;;  %vm1114_vm5 = vweird.f32 %v2462_v43  ;;  %v1118_v44 = vand.u32 2147483647, %v2462_v43  ;;  %v1324_v30 = vld [vmem:[%s2692_s28 + $0x8] sm:$0xff] }
0x10a0   :  { %v1052_v57 = vmul.f32 %v1856_v37, %v1051_v48  ;;  %v1096_v47 = vsub.f32 1.0, %v1095_v41  ;;  %1346 = vmatpush.msra.mxu2 %v1324_v30 }
0x10a1   :  { %1221 = vrot.lane.b32.xlu2 %v1093_v38, %s1895_s9  ;;  %v1127_v11 = vmul.f32 %v1858_v0, %v1126_v5 }
0x10a2   :  { %v1053_v39 = vadd.f32 %v1856_v37, %v1052_v57  ;;  %v1097_v25 = vmul.f32 %v1860_v24, %v1096_v47 }
0x10a3   :  { %v1128_v12 = vadd.f32 %v1858_v0, %v1127_v11  ;;  %v1862_v28 = vpop.eup %1861 }
0x10a4   :  { %v1057_v63 = vsel %vm1056_vm6, %v1856_v37, %v1053_v39  ;;  %v2464_v6 = vpop.permute.xlu2 %1039  ;;  %v1098_v29 = vadd.f32 %v1860_v24, %v1097_v25  ;;  %v1110_v42 = vmul.f32 %v1862_v28, %v2462_v43  ;;  %vm1115_vm4 = vweird.f32 %v1862_v28 }
0x10a5   :  { %v1062_v40 = vsel %vm1059_vm7, %v1061_v62, %v1057_v63  ;;  %v1132_v19 = vsel %vm1131_vm14, %v1858_v0, %v1128_v12  ;;  %1863 = vrcp.f32 %v2464_v6  ;;  %vm1116_vm6 = vmor %vm1114_vm5, %vm1115_vm4  ;;  %v1121_v63 = vor.u32 1.1754944e-38, %v1120_v21 }
0x10a6   :  { %1257 = vrot.lane.b32.xlu1 %v1209_v23, %s1895_s9  ;;  %v1063_v2 = vmul.f32 %v2401_v7, %v1062_v40  ;;  %v1137_v49 = vsel %vm1134_vm15, %v1136_v15, %v1132_v19  ;;  %s1902_s9 = smov 20   ;;  %v1102_v58 = vsel %vm1101_vm2, %v1860_v24, %v1098_v29  ;;  %vm1119_vm7 = vcmp.eq.f32.partialorder %v1118_v44, 8.507059e+37 }
0x10a7   :  { %v1138_v26 = vmul.f32 %v1137_v49, %v2240_v10  ;;  %v1103_v10 = vand.u32 2147483647, %v1032_v8  ;;  %v1165_v19 = vand.u32 2147483648, %v2464_v6  ;;  %vm1159_vm1 = vweird.f32 %v2464_v6 }
0x10a8   :  { %1217 = vrot.lane.b32.xlu0 %v1063_v2, %s1894_s7  ;;  %s1901_s7 = smov 8   ;;  %v1163_v24 = vand.u32 2147483647, %v2464_v6 }
0x10a9   :  { %vm1104_vm3 = vcmp.eq.f32.partialorder %v1103_v10, 8.507059e+37 }
0x10aa   :  { %v1107_v33 = vsel %vm1104_vm3, %v1106_v53, %v1102_v58  ;;  %vm1164_vm3 = vcmp.eq.f32.partialorder %v1163_v24, 8.507059e+37  ;;  %v1323_v53 = vld [vmem:[%s2692_s28] sm:$0xff] }
0x10ab   :  { %v1864_v34 = vpop.eup %1863  ;;  %1347 = vmatpush.msra.mxu2 %v1323_v53 }
0x10ac   :  { %v1155_v35 = vmul.f32 %v1864_v34, %v2464_v6  ;;  %vm1160_vm0 = vweird.f32 %v1864_v34 }
0x10ad   :  { %vm1161_vm2 = vmor %vm1159_vm1, %vm1160_vm0  ;;  %vm1321_vm0 = vcmask 195584   ;;  %vm1361_vm1 = vcmask 228352  }
0x10e3   :  { %v1268_v13 = vpop.permute.xlu2 %1267 }
0x10e4   :  { %v1270_v7 = vsel %vm328_vm9, %v2181_v51, %v1268_v13 }
0x10e5   :  { %1296 = vrot.lane.b32.xlu2 %v1270_v7, %s1901_s7 }
0x10eb   :  { %v1283_v27 = vpop.permute.xlu2 %1282 }
0x10ec   :  { %v1285_v51 = vsel %vm328_vm9, %v2305_v56, %v1283_v27  ;;  %v1111_v56 = vsub.f32 1.0, %v1110_v42 }
0x10ed   :  { %1233 = vrot.lane.b32.xlu2 %v1138_v26, %s1901_s7  ;;  %s1906_s7 = smov 10  }
0x10ee   :  { %v1112_v37 = vmul.f32 %v1862_v28, %v1111_v56 }
0x10f0   :  { %v1113_v55 = vadd.f32 %v1862_v28, %v1112_v37 }
0x10f2   :  { %v1117_v23 = vsel %vm1116_vm6, %v1862_v28, %v1113_v55 }
0x10f3   :  { %v1122_v0 = vsel %vm1119_vm7, %v1121_v63, %v1117_v23  ;;  %v1028_v6 = vpop.permute.xlu2 %1027 }
0x10f4   :  { %v1075_v37 = vand.u32 2147483648, %v1028_v6  ;;  %vm1069_vm5 = vweird.f32 %v1028_v6 }
0x10f5   :  { %1308 = vrot.lane.b32.xlu2 %v1285_v51, %s1902_s9  ;;  %s1907_s9 = smov 24  }
0x10f8   :  { %v943_v16 = vpop.permute.xlu1 %942 }
0x10f9   :  { %v945_v31 = vmul.f32 %v943_v16, %v2419_v32  ;;  %v1108_v32 = vmul.f32 %v1890_v36, %v1107_v33 }
0x10fb   :  { %947 = vrot.lane.b32.xlu1 %v945_v31, %s1900_s29  ;;  %v1273_v48 = vpop.permute.xlu0 %1272  ;;  %v1222_v31 = vpop.permute.xlu2 %1221 }
0x10fc   :  { %v1275_v62 = vsel %vm328_vm9, %v2223_v46, %v1273_v48  ;;  %v1891_v46 = vld [vmem:[%s2685_s8 + $0x20] sm:$0xff] }
0x10fd   :  { %v1123_v11 = vmul.f32 %v1891_v46, %v1122_v0 }
0x1100   :  { %v1038_v60 = vpop.permute.xlu1 %1037 }
0x1101   :  { %1865 = vrcp.f32 %v1038_v60  ;;  %v1150_v40 = vand.u32 2147483648, %v1038_v60  ;;  %v1148_v43 = vand.u32 2147483647, %v1038_v60  ;;  %vm1144_vm13 = vweird.f32 %v1038_v60 }
0x1102   :  { %1867 = vrcp.f32 %v1028_v6 }
0x1103   :  { %1225 = vrot.lane.b32.xlu1 %v1108_v32, %s1903_s4  ;;  %v1151_v5 = vor.u32 1.1754944e-38, %v1150_v40  ;;  %vm1149_vm15 = vcmp.eq.f32.partialorder %v1148_v43, 8.507059e+37  ;;  %v1288_v15 = vpop.permute.xlu0 %1287 }
0x1104   :  { %v1290_v26 = vsel %vm328_vm9, %v2345_v61, %v1288_v15  ;;  %v1389_v15 = vld [vmem:[%s2693_s12] sm:$0xff] }
0x1107   :  { %v1866_v22 = vpop.eup %1865 }
0x1108   :  { %v1140_v54 = vmul.f32 %v1866_v22, %v1038_v60  ;;  %v1263_v38 = vpop.permute.xlu1 %1262  ;;  %vm1145_vm12 = vweird.f32 %v1866_v22  ;;  %v1868_v28 = vpop.eup %1867 }
0x1109   :  { %v1265_v57 = vsel %vm328_vm9, %v2122_v50, %v1263_v38  ;;  %v1156_v50 = vsub.f32 1.0, %v1155_v35  ;;  %vm1146_vm14 = vmor %vm1144_vm13, %vm1145_vm12  ;;  %v1065_v16 = vmul.f32 %v1868_v28, %v1028_v6  ;;  %vm1070_vm4 = vweird.f32 %v1868_v28 }
0x110a   :  { %v1141_v39 = vsub.f32 1.0, %v1140_v54  ;;  %1292 = vrot.lane.b32.xlu0 %v1265_v57, %s1903_s4  ;;  %s2691_s4 = sld [smem:[#allocation8_spill]]  ;;  %vm1071_vm6 = vmor %vm1069_vm5, %vm1070_vm4  ;;  %vm1248_vm12 = vcmask 64512   ;;  %vm1252_vm13 = vcmask 97280  }
0x110b   :  { %1300 = vrot.lane.b32.xlu1 %v1275_v62, %s1904_s11  ;;  %v1157_v59 = vmul.f32 %v1864_v34, %v1156_v50  ;;  %v1066_v42 = vsub.f32 1.0, %v1065_v16 }
0x110c   :  { %v1142_v2 = vmul.f32 %v1866_v22, %v1141_v39 }
0x110d   :  { %v1158_v7 = vadd.f32 %v1864_v34, %v1157_v59  ;;  %v1067_v56 = vmul.f32 %v1868_v28, %v1066_v42  ;;  %v1892_v59 = vld [vmem:[%s2690_s10] ss:$0 sm:$0xff] }
0x110e   :  { %v1143_v3 = vadd.f32 %v1866_v22, %v1142_v2 }
0x110f   :  { %v1162_v41 = vsel %vm1161_vm2, %v1864_v34, %v1158_v7  ;;  %v1068_v36 = vadd.f32 %v1868_v28, %v1067_v56  ;;  %v1073_v34 = vand.u32 2147483647, %v1028_v6  ;;  %vm1250_vm2 = vcmask 80896  }
0x1110   :  { %v1147_v8 = vsel %vm1146_vm14, %v1866_v22, %v1143_v3  ;;  %v1278_v18 = vpop.permute.xlu1 %1277  ;;  %v1355_v51 = vld [vmem:[%s2691_s4 + $0x10] sm:$0xff]  ;;  %v1353_v29 = vld [vmem:[%s2691_s4] sm:$0xff]  ;;  %v1076_v22 = vor.u32 1.1754944e-38, %v1075_v37  ;;  %vm1246_vm14 = vcmask 48128  }
0x1111   :  { %v1152_v12 = vsel %vm1149_vm15, %v1151_v5, %v1147_v8  ;;  %v1280_v49 = vsel %vm328_vm9, %v2265_v52, %v1278_v18  ;;  %v1356_v52 = vld [vmem:[%s2691_s4 + $0x18] sm:$0xf]  ;;  %v1072_v55 = vsel %vm1071_vm6, %v1868_v28, %v1068_v36  ;;  %vm1074_vm7 = vcmp.eq.f32.partialorder %v1073_v34, 8.507059e+37  ;;  %v1451_v36 = vld [vmem:[%s2653_s16 + $0x8] sm:$0xff]  ;;  %v1760_v37 = vld [vmem:[%s2652_s14] ss:$0 sm:$0xff] }
0x1112   :  { %1229 = vrot.lane.b32.xlu0 %v1123_v11, %s1905_s5  ;;  %v1153_v13 = vmul.f32 %v1152_v12, %v2283_v20  ;;  %v1166_v20 = vor.u32 1.1754944e-38, %v1165_v19  ;;  %1727 = vmatpush.msk.msra.mxu3 %vm388_vm8, %v1356_v52  ;;  %v1077_v48 = vsel %vm1074_vm7, %v1076_v22, %v1072_v55  ;;  %vm1319_vm15 = vcmask 162816   ;;  %v502_v12 = vpop.f32.mrf.mxu1  ;;  %v1390_v19 = vld [vmem:[%s2693_s12 + $0x8] sm:$0xff]  ;;  %s2695_s12 = sld [smem:[#allocation11_spill]] }
0x1113   :  { %v1078_v35 = vmul.f32 %v2386_v4, %v1077_v48 }
0x1114   :  { %1237 = vrot.lane.b32.xlu1 %v1153_v13, %s1906_s7  ;;  %v1167_v47 = vsel %vm1164_vm3, %v1166_v20, %v1162_v41  ;;  %1381 = vmatpush.msra.mxu3 %v1355_v51  ;;  %vm1254_vm3 = vcmask 113664   ;;  %v503_v13 = vadd.f32 %v1892_v59, %v502_v12  ;;  %s2694_s7 = sld [smem:[#allocation10_spill]] }
0x1115   :  { %v1168_v27 = vmul.f32 %v1167_v47, %v2322_v17  ;;  %v1354_v17 = vld [vmem:[%s2691_s4 + $0x8] sm:$0xff] }
0x1116   :  { %1382 = vmatpush.msra.mxu3 %v1354_v17 }
0x1118   :  { %v1258_v25 = vpop.permute.xlu1 %1257  ;;  %1383 = vmatpush.msra.mxu3 %v1353_v29 }
0x1119   :  { %v1260_v38 = vsel %vm328_vm9, %v2112_v45, %v1258_v25 }
0x111a   :  { %1304 = vrot.lane.b32.xlu0 %v1280_v49, %s1898_s30  ;;  %v1218_v10 = vpop.permute.xlu0 %1217  ;;  %v1391_v49 = vld [vmem:[%s2651_s13] sm:$0xf] }
0x111b   :  { %v1244_v39 = vsel %vm328_vm9, %v1218_v10, %v1078_v35  ;;  %1729 = vmatpush.msk.msrb.mxu2 %vm388_vm8, %v1391_v49  ;;  %v1758_v41 = vld [vmem:[%s2694_s7] ss:$0 sm:$0xff]  ;;  %v1449_v35 = vld [vmem:[%s2654_s15 + $0x8] sm:$0xff] }
0x111c   :  { %1312 = vrot.lane.b32.xlu1 %v1290_v26, %s1907_s9  ;;  %v1245_v23 = vsel %vm363_vm10, %v1244_v39, %v1222_v31  ;;  %v1448_v39 = vld [vmem:[%s2654_s15] sm:$0xff] }
0x1122   :  { %1241 = vrot.lane.b32.xlu0 %v1168_v27, %s1904_s11  ;;  %v1759_v27 = vld [vmem:[%s2695_s12] ss:$0 sm:$0xff] }
0x113f   :  { %v1297_v33 = vpop.permute.xlu2 %1296 }
0x1147   :  { %v1234_v21 = vpop.permute.xlu2 %1233 }
0x114f   :  { %v1309_v45 = vpop.permute.xlu2 %1308 }
0x116d   :  { %v948_v61 = vpop.permute.xlu1 %947 }
0x116e   :  { %1724 = vmatmul.msk.f32.vlgmr.msrb.gmra.mxu3 %vm439_vm11, %v948_v61 }
0x116f   :  { %1435 = vmatpush.msrb.mxu3 %v1390_v19 }
0x1171   :  { %1436 = vmatpush.msrb.mxu3 %v1389_v15  ;;  %v1763_v15 = vld [vmem:[%s2662_s23] ss:$0 sm:$0xff] }
0x1175   :  { %v1226_v58 = vpop.permute.xlu1 %1225 }
0x1176   :  { %v1247_v2 = vsel %vm1246_vm14, %v1245_v23, %v1226_v58 }
0x117c   :  { %v1293_v60 = vpop.permute.xlu0 %1292 }
0x117d   :  { %v1301_v32 = vpop.permute.xlu1 %1300  ;;  %v1315_v44 = vsel %vm363_vm10, %v1260_v38, %v1293_v60 }
0x117e   :  { %v1316_v62 = vsel %vm1248_vm12, %v1315_v44, %v1297_v33 }
0x117f   :  { %v1317_v63 = vsel %vm1252_vm13, %v1316_v62, %v1301_v32  ;;  %v1450_v32 = vld [vmem:[%s2653_s16] sm:$0xff] }
0x1180   :  { %v1500_v62 = vld [vmem:[%s2655_s17] sm:$0xff] }
0x1184   :  { %v1230_v54 = vpop.permute.xlu0 %1229 }
0x1185   :  { %v1249_v4 = vsel %vm1248_vm12, %v1247_v2, %v1230_v54  ;;  %v1563_v2 = vld [vmem:[%s2659_s21 + $0x8] sm:$0xff] }
0x1186   :  { %v1238_v57 = vpop.permute.xlu1 %1237  ;;  %v1251_v5 = vsel %vm1250_vm2, %v1249_v4, %v1234_v21  ;;  %1606 = vmatpush.msrb.mxu1 %v1563_v2  ;;  %v1562_v4 = vld [vmem:[%s2659_s21] sm:$0xff] }
0x1187   :  { %v1253_v46 = vsel %vm1252_vm13, %v1251_v5, %v1238_v57 }
0x1188   :  { %1607 = vmatpush.msrb.mxu1 %v1562_v4 }
0x118c   :  { %v1305_v40 = vpop.permute.xlu0 %1304 }
0x118d   :  { %v1318_v43 = vsel %vm439_vm11, %v1317_v63, %v1305_v40  ;;  %v1447_v63 = vld [vmem:[%s2656_s2] sm:$0x1] }
0x118e   :  { %v1313_v0 = vpop.permute.xlu1 %1312  ;;  %v1320_v50 = vsel %vm1319_vm15, %v1318_v43, %v1309_v45  ;;  %v1533_v40 = vld [vmem:[%s2657_s19] sm:$0xf]  ;;  %v1565_v45 = vld [vmem:[%s2658_s22 + $0x8] sm:$0xff] }
0x118f   :  { %v1322_v3 = vsel %vm1321_vm0, %v1320_v50, %v1313_v0  ;;  %v1564_v43 = vld [vmem:[%s2658_s22] sm:$0xff]  ;;  %1583 = vmatpush.msrb.mxu0 %v1565_v45 }
0x1190   :  { %1728 = vmatmul.msk.f32.vlgmr.msra.gmra.mxu3 %vm1361_vm1, %v1322_v3 }
0x1191   :  { %1494 = vmatpush.msra.mxu3 %v1449_v35  ;;  %1584 = vmatpush.msrb.mxu0 %v1564_v43 }
0x1193   :  { %1495 = vmatpush.msra.mxu3 %v1448_v39 }
0x1194   :  { %v1242_v11 = vpop.permute.xlu0 %1241 }
0x1195   :  { %v1255_v8 = vsel %vm1254_vm3, %v1253_v46, %v1242_v11 }
0x1196   :  { %1726 = vmatmul.msk.f32.vlgmr.msra.gmra.mxu2 %vm439_vm11, %v1255_v8  ;;  %v1761_v8 = vld [vmem:[%s2660_s18] ss:$0 sm:$0xff]  ;;  %s1908_s18 = smov 48  }
0x1197   :  { %1469 = vmatpush.msra.mxu2 %v1451_v36 }
0x1199   :  { %1470 = vmatpush.msra.mxu2 %v1450_v32  ;;  %v1764_v32 = vld [vmem:[%s2663_s25] ss:$0 sm:$0xff] }
0x11f1   :  { %v968_v18 = vpop.f32.mrf.mxu3 }
0x11f2   :  { %v971_v7 = vadd.f32 %v968_v18, %v503_v13  ;;  %v1762_v13 = vld [vmem:[%s2661_s20] ss:$0 sm:$0xff] }
0x11f4   :  { %1869 = vtanh.f32 %v971_v7  ;;  %v1725_v51 = vmul.f32 -1.442695, %v971_v7 }
0x11f6   :  { %1871 = vpow2.f32 %v1725_v51 }
0x11fa   :  { %v1870_v24 = vpop.eup %1869 }
0x11fb   :  { %994 = vrot.lane.b32.xlu2 %v1870_v24, %s1897_s6 }
0x11fc   :  { %v1872_v61 = vpop.eup %1871 }
0x11fd   :  { %v975_v17 = vadd.f32 1.0, %v1872_v61 }
0x11ff   :  { %1873 = vrcp.f32 %v975_v17  ;;  %v987_v10 = vand.u32 2147483648, %v975_v17  ;;  %vm981_vm5 = vweird.f32 %v975_v17  ;;  %v985_v42 = vand.u32 2147483647, %v975_v17 }
0x1201   :  { %v988_v53 = vor.u32 1.1754944e-38, %v987_v10  ;;  %vm986_vm7 = vcmp.eq.f32.partialorder %v985_v42, 8.507059e+37 }
0x1205   :  { %v1874_v28 = vpop.eup %1873 }
0x1206   :  { %v977_v29 = vmul.f32 %v1874_v28, %v975_v17  ;;  %vm982_vm4 = vweird.f32 %v1874_v28 }
0x1207   :  { %vm983_vm6 = vmor %vm981_vm5, %vm982_vm4 }
0x1208   :  { %v978_v30 = vsub.f32 1.0, %v977_v29 }
0x120a   :  { %v979_v16 = vmul.f32 %v1874_v28, %v978_v30 }
0x120c   :  { %v980_v31 = vadd.f32 %v1874_v28, %v979_v16 }
0x120e   :  { %v984_v58 = vsel %vm983_vm6, %v1874_v28, %v980_v31 }
0x120f   :  { %v989_v33 = vsel %vm986_vm7, %v988_v53, %v984_v58  ;;  %v1649_v53 = vld [vmem:[%s2664_s24 + $0x8] sm:$0xff] }
0x1210   :  { %v992_v54 = vmul.f32 %v989_v33, %v2435_v1 }
0x1213   :  { %v1385_v20 = vpop.f32.mrf.mxu3 }
0x1214   :  { %v1386_v26 = vadd.f32 %v1758_v41, %v1385_v20 }
0x1216   :  { %v1388_v47 = vmax.f32 %v1386_v26, 0.0 }
0x1218   :  { %1731 = vmatmul.msk.f32.vlgmr.msrb.gmra.mxu3 %vm439_vm11, %v1388_v47 }
0x1219   :  { %v1349_v6 = vpop.f32.mrf.mxu2  ;;  %1735 = vmatpush.msk.msrb.mxu3 %vm388_vm8, %v1533_v40 }
0x121a   :  { %v1350_v25 = vadd.f32 %v1759_v27, %v1349_v6 }
0x121c   :  { %v1352_v52 = vmax.f32 %v1350_v25, 0.0 }
0x121e   :  { %1730 = vmatmul.msk.f32.vlgmr.msrb.gmra.mxu2 %vm363_vm10, %v1352_v52 }
0x121f   :  { %1519 = vmatpush.msrb.mxu2 %v1500_v62 }
0x1255   :  { %v995_v56 = vpop.permute.xlu2 %994 }
0x1256   :  { %v997_v60 = vmul.f32 %v995_v56, %v989_v33  ;;  %v1648_v56 = vld [vmem:[%s2664_s24] sm:$0xff] }
0x1258   :  { %999 = vrot.lane.b32.xlu0 %v997_v60, %s1898_s30 }
0x129b   :  { %v1438_v34 = vpop.f32.mrf.mxu3 }
0x12a1   :  { %v1415_v55 = vpop.f32.mrf.mxu2 }
0x12a2   :  { %v1439_v22 = vadd.f32 %v1438_v34, %v1415_v55 }
0x12a4   :  { %v1445_v21 = vadd.f32 %v1760_v37, %v1439_v22 }
0x12a6   :  { %v1446_v48 = vmax.f32 %v1445_v21, 0.0  ;;  %v1893_v21 = vld [vmem:[%s2685_s8 + $0x40] sm:$0xff] }
0x12a8   :  { %1732 = vmatmul.msk.f32.vlgmr.msra.gmra.mxu2 %vm439_vm11, %v1446_v48  ;;  %v1532_v48 = vsel %vm328_vm9, %v2406_v9, %v1893_v21 }
0x12a9   :  { %1673 = vmatpush.msra.mxu2 %v1649_v53 }
0x12ab   :  { %1674 = vmatpush.msra.mxu2 %v1648_v56 }
0x12b0   :  { %1734 = vmatmul.msk.f32.vlgmr.msrb.gmra.mxu2 %vm1248_vm12, %v1447_v63 }
0x12ca   :  { %v1000_v38 = vpop.permute.xlu0 %999 }
0x12cb   :  { %v1002_v44 = vadd.f32 %v1000_v38, %v992_v54 }
0x12cd   :  { %1875 = vtanh.f32 %v1002_v44 }
0x12d3   :  { %v1876_v57 = vpop.eup %1875 }
0x12d4   :  { %1005 = vrot.lane.b32.xlu1 %v1876_v57, %s1899_s0 }
0x132b   :  { %v1472_v50 = vpop.f32.mrf.mxu2 }
0x1333   :  { %v1521_v3 = vpop.f32.mrf.mxu2 }
0x1334   :  { %v1524_v5 = vperm.slane %v1521_v3, 0 }
0x1346   :  { %v1006_v1 = vpop.permute.xlu1 %1005 }
0x1347   :  { %v1008_v23 = vmul.f32 %v1006_v1, %v989_v33 }
0x1349   :  { %1476 = vrot.lane.b32.xlu2 %v1008_v23, %s1900_s29 }
0x13a3   :  { %v1477_v0 = vpop.permute.xlu2 %1476 }
0x13a4   :  { %1733 = vmatmul.msk.f32.vlgmr.msra.gmra.mxu3 %vm439_vm11, %v1477_v0 }
0x13ac   :  { %1736 = vmatmul.msk.f32.vlgmr.msrb.gmra.mxu3 %vm363_vm10, %v2411_v14 }
0x1427   :  { %v1497_v46 = vpop.f32.mrf.mxu3 }
0x1428   :  { %v1498_v11 = vadd.f32 %v1497_v46, %v1472_v50 }
0x142a   :  { %v1525_v12 = vadd.f32 %v1524_v5, %v1498_v11 }
0x142c   :  { %v1530_v59 = vadd.f32 %v1761_v8, %v1525_v12 }
0x142e   :  { %v1531_v18 = vmax.f32 %v1530_v59, 0.0 }
0x142f   :  { %v1558_v7 = vpop.f32.mrf.mxu3 }
0x1430   :  { %v1559_v19 = vadd.f32 %v1762_v13, %v1558_v7  ;;  %1737 = vmatmul.msk.f32.vlgmr.msrb.gmra.mxu0 %vm439_vm11, %v1531_v18 }
0x1432   :  { %v1561_v14 = vmax.f32 %v1559_v19, 0.0 }
0x1434   :  { %1738 = vmatmul.msk.f32.vlgmr.msrb.gmra.mxu1 %vm439_vm11, %v1561_v14 }
0x14ad   :  { %v1586_v24 = vpop.f32.mrf.mxu0 }
0x14b1   :  { %v1609_v49 = vpop.f32.mrf.mxu1 }
0x14b2   :  { %v1610_v41 = vadd.f32 %v1609_v49, %v1586_v24 }
0x14b4   :  { %v1616_v20 = vadd.f32 %v1763_v15, %v1610_v41 }
0x14b6   :  { %1877 = vtanh.f32 %v1616_v20  ;;  %v1739_v47 = vmul.f32 -1.442695, %v1616_v20 }
0x14b8   :  { %1879 = vpow2.f32 %v1739_v47 }
0x14bc   :  { %v1878_v26 = vpop.eup %1877 }
0x14bd   :  { %1638 = vrot.lane.b32.xlu0 %v1878_v26, %s1897_s6 }
0x14be   :  { %v1880_v27 = vpop.eup %1879 }
0x14bf   :  { %v1620_v6 = vadd.f32 1.0, %v1880_v27 }
0x14c1   :  { %1881 = vrcp.f32 %v1620_v6  ;;  %v1632_v28 = vand.u32 2147483648, %v1620_v6  ;;  %vm1626_vm12 = vweird.f32 %v1620_v6  ;;  %v1630_v29 = vand.u32 2147483647, %v1620_v6 }
0x14c3   :  { %v1633_v16 = vor.u32 1.1754944e-38, %v1632_v28  ;;  %vm1631_vm14 = vcmp.eq.f32.partialorder %v1630_v29, 8.507059e+37 }
0x14c7   :  { %v1882_v25 = vpop.eup %1881 }
0x14c8   :  { %v1622_v52 = vmul.f32 %v1882_v25, %v1620_v6  ;;  %vm1627_vm8 = vweird.f32 %v1882_v25 }
0x14c9   :  { %vm1628_vm13 = vmor %vm1626_vm12, %vm1627_vm8 }
0x14ca   :  { %v1623_v51 = vsub.f32 1.0, %v1622_v52 }
0x14cc   :  { %v1624_v61 = vmul.f32 %v1882_v25, %v1623_v51 }
0x14ce   :  { %v1625_v17 = vadd.f32 %v1882_v25, %v1624_v61 }
0x14d0   :  { %v1629_v30 = vsel %vm1628_vm13, %v1882_v25, %v1625_v17 }
0x14d1   :  { %v1634_v10 = vsel %vm1631_vm14, %v1633_v16, %v1629_v30 }
0x152f   :  { %v1639_v31 = vpop.permute.xlu0 %1638 }
0x1530   :  { %v1641_v42 = vmul.f32 %v1639_v31, %v1634_v10 }
0x1532   :  { %1883 = vtanh.f32 %v1641_v42 }
0x1538   :  { %v1884_v58 = vpop.eup %1883 }
0x1539   :  { %1644 = vrot.lane.b32.xlu1 %v1884_v58, %s1908_s18 }
0x15ab   :  { %v1645_v33 = vpop.permute.xlu1 %1644 }
0x15ac   :  { %v1647_v60 = vmul.f32 %v1645_v33, %v1634_v10 }
0x15ae   :  { %1655 = vrot.lane.b32.xlu2 %v1647_v60, %s1900_s29 }
0x1608   :  { %v1656_v36 = vpop.permute.xlu2 %1655 }
0x1609   :  { %1740 = vmatmul.msk.f32.vlgmr.msra.gmra.mxu2 %vm439_vm11, %v1656_v36 }
0x168c   :  { %v1676_v37 = vpop.f32.mrf.mxu2 }
0x168d   :  { %v1677_v34 = vadd.f32 %v1764_v32, %v1676_v37 }
0x168f   :  { %v1680_v55 = vmul.f32 1.442695, %v1677_v34  ;;  %1684 = vst.msk [vmem:[%s2665_s27] sm:$0xff] %vm363_vm10, %v1677_v34  ;;  %v1679_v54 = vadd.f32 %v1677_v34, %v1532_v48 }
0x1691   :  { %1885 = vpow2.f32 %v1680_v55 }
0x1697   :  { %v1886_v22 = vpop.eup %1885 }
0x1698   :  { %v1682_v38 = vmul.f32 %v1886_v22, %v1532_v48 }
0x169a   :  { %v1683_v44 = vsel %vm328_vm9, %v1679_v54, %v1682_v38 }
0x169b   :  { %1685 = vst.msk [vmem:[%s2666_s26] sm:$0xff] %vm363_vm10, %v1683_v44 }

</bundles_post_ra>
